<compile_context>
chip_gen: v6e
topology: v6e:2x2x1
jax: 0.10.0
libtpu: 0.0.40
codegen_flags: <defaults>
</compile_context>

<pallas_src>
import functools
import math

import jax
import jax.numpy as jnp
from jax import lax
from jax.experimental import pallas as pl
from jax.experimental.pallas import tpu as pltpu

LN_EPS = 1e-5


def _layernorm(x, gamma, beta):
    mean = jnp.mean(x, axis=-1, keepdims=True)
    xc = x - mean
    var = jnp.mean(xc * xc, axis=-1, keepdims=True)
    inv = lax.rsqrt(var + LN_EPS)
    return xc * inv * gamma + beta


def _gelu_exact(x):
    # PyTorch nn.GELU() default: exact erf form (f32).
    return 0.5 * x * (1.0 + lax.erf(x * 0.7071067811865476))


def encoder_layer_kernel(
    x_ref,        # (Bt, S, D) f32
    in_wt_ref,    # (D, 3D)    bf16   in_proj_weight^T, Q columns pre-scaled
    in_b_ref,     # (1, 3D)    f32    in_proj_bias,     Q part pre-scaled
    out_wt_ref,   # (D, D)     bf16   out_proj.weight^T
    out_b_ref,    # (1, D)     f32
    w1t_ref,      # (D, F)     bf16   linear1.weight^T
    b1_ref,       # (1, F)     f32
    w2t_ref,      # (F, D)     bf16   linear2.weight^T
    b2_ref,       # (1, D)     f32
    g1_ref,       # (1, D)     f32    norm1.weight
    bt1_ref,      # (1, D)     f32    norm1.bias
    g2_ref,       # (1, D)     f32    norm2.weight
    bt2_ref,      # (1, D)     f32    norm2.bias
    o_ref,        # (Bt, S, D) f32
    *, nhead,
):
    Bt, S, D = x_ref.shape
    hd = D // nhead
    M = Bt * S                                   # batch folded into matmul rows

    x = x_ref[...].reshape(M, D)                 # (M, D) f32

    # --- fused QKV projection: one (M x D)@(D x 3D) MXU contraction ---
    qkv = jnp.dot(x.astype(jnp.bfloat16), in_wt_ref[...],
                  preferred_element_type=jnp.float32) + in_b_ref[0]   # (M, 3D) f32

    def heads(t):                                # (M, D) f32 -> (Bt*H, S, hd) bf16
        t = t.astype(jnp.bfloat16).reshape(Bt, S, nhead, hd)
        return jnp.transpose(t, (0, 2, 1, 3)).reshape(Bt * nhead, S, hd)

    q = heads(qkv[:, :D])                        # scale already folded into weights
    k = heads(qkv[:, D:2 * D])
    v = heads(qkv[:, 2 * D:])

    # --- attention, batched over (batch, head); f32 accumulation ---
    s = jnp.einsum('bqd,bkd->bqk', q, k,
                   preferred_element_type=jnp.float32)                # (Bt*H, S, S)
    s = s - jnp.max(s, axis=-1, keepdims=True)
    p = jnp.exp(s)
    p = p * pl.reciprocal(jnp.sum(p, axis=-1, keepdims=True), approx=True)
    ctx = jnp.einsum('bqk,bkd->bqd', p.astype(jnp.bfloat16), v,
                     preferred_element_type=jnp.float32)              # (Bt*H, S, hd)

    # merge heads back to (M, D)
    attn = jnp.transpose(ctx.reshape(Bt, nhead, S, hd),
                         (0, 2, 1, 3)).reshape(M, D)
    attn = jnp.dot(attn.astype(jnp.bfloat16), out_wt_ref[...],
                   preferred_element_type=jnp.float32) + out_b_ref[0]

    # --- residual + norm1 (f32) ---
    y = _layernorm(x + attn, g1_ref[0], bt1_ref[0])

    # --- feed-forward (bf16 matmul operands, f32 elementwise) ---
    h1 = jnp.dot(y.astype(jnp.bfloat16), w1t_ref[...],
                 preferred_element_type=jnp.float32) + b1_ref[0]
    h1 = _gelu_exact(h1)
    h2 = jnp.dot(h1.astype(jnp.bfloat16), w2t_ref[...],
                 preferred_element_type=jnp.float32) + b2_ref[0]

    # --- residual + norm2 ---
    o_ref[...] = _layernorm(y + h2, g2_ref[0], bt2_ref[0]).reshape(Bt, S, D)


def _const_spec(shape):
    # Grid-invariant block: constant index_map (no re-DMA after step 0) and
    # single-buffered so it doesn't hold two VMEM copies of every weight.
    zeros = tuple(0 for _ in shape)
    return pl.BlockSpec(shape, lambda b, _z=zeros: _z,
                        pipeline_mode=pl.Buffered(1))


def _choose_b_tile(B, S, target_rows=256):
    """Pick batch tile so matmul rows >= ~256, keeping >=2 grid steps if possible."""
    bt = max(1, min(B, max(1, target_rows // max(S, 1))))
    while bt > 1 and (B + bt - 1) // bt < 2:   # keep both v7x TensorCores busy
        bt -= 1
    while B % bt:                              # require exact divisibility
        bt -= 1
    return bt


def _vmem_cap_bytes():
    try:
        phys = pltpu.get_tpu_info().vmem_capacity_bytes
    except Exception:
        phys = 64 << 20                        # conservative (v7x per-TC)
    return max(phys - (12 << 20), 16 << 20)


def _vmem_estimate_bytes(bt, S, D, F, nhead):
    bf2, f4 = 2, 4
    m = bt * S
    weights = (3 * D * D + D * D + 2 * D * F) * bf2      # bf16, single-buffered
    vectors = (3 * D + D + F + D + 4 * D) * f4           # biases + LN params
    io = 2 * 2 * m * D * f4                              # x + o, double-buffered
    acts = m * 3 * D * (f4 + bf2)                        # qkv f32 + q/k/v bf16
    acts += 2 * nhead * bt * S * S * f4                  # scores + probs
    acts += nhead * bt * S * (D // nhead) * (f4 + bf2)   # ctx + bf16 copy
    acts += 4 * m * D * f4                               # attn, y, h2, out
    acts += 2 * m * F * f4                               # h1 pre/post GELU
    return weights + vectors + io + acts


def prepare_kernel_params(params, *, nhead):
    """One-time host-side prep: transpose weights, fold Q scale, cast to bf16."""
    D = params["out_w"].shape[0]
    hd = D // nhead
    scale = 1.0 / math.sqrt(hd)
    qscale = jnp.concatenate([jnp.full((D,), scale, jnp.float32),
                              jnp.ones((2 * D,), jnp.float32)])
    in_w = params["in_w"] * qscale[:, None]        # (3D, D): scale Q rows
    in_b = params["in_b"] * qscale[None, :]        # (1, 3D)
    return {
        "in_wt":  jnp.transpose(in_w).astype(jnp.bfloat16),             # (D, 3D)
        "in_b":   in_b,
        "out_wt": jnp.transpose(params["out_w"]).astype(jnp.bfloat16),  # (D, D)
        "out_b":  params["out_b"],
        "w1t":    jnp.transpose(params["w1"]).astype(jnp.bfloat16),     # (D, F)
        "b1":     params["b1"],
        "w2t":    jnp.transpose(params["w2"]).astype(jnp.bfloat16),     # (F, D)
        "b2":     params["b2"],
        "g1":     params["g1"], "bt1": params["bt1"],
        "g2":     params["g2"], "bt2": params["bt2"],
    }


def transformer_encoder_layer(src, kparams, *, nhead, batch_first=False, b_tile=None):
    """src: (S, B, D) float32 (PyTorch MultiheadAttention layout) unless batch_first."""
    x = src if batch_first else jnp.transpose(src, (1, 0, 2))   # (B, S, D)
    B, S, D = x.shape
    F = kparams["w1t"].shape[1]
    assert D % nhead == 0

    bt = _choose_b_tile(B, S) if b_tile is None else b_tile
    assert B % bt == 0
    nb = B // bt

    vmem_limit = int(min(
        max(2 * _vmem_estimate_bytes(bt, S, D, F, nhead) + (16 << 20), 32 << 20),
        _vmem_cap_bytes()))

    out = pl.pallas_call(
        functools.partial(encoder_layer_kernel, nhead=nhead),
        out_shape=jax.ShapeDtypeStruct((B, S, D), jnp.float32),
        grid_spec=pltpu.PrefetchScalarGridSpec(
            num_scalar_prefetch=0,
            grid=(nb,),
            in_specs=[
                pl.BlockSpec((bt, S, D), lambda b: (b, 0, 0)),   # x (double-buffered)
                _const_spec((D, 3 * D)),                         # in_proj_weight^T
                _const_spec((1, 3 * D)),                         # in_proj_bias
                _const_spec((D, D)),                             # out_proj.weight^T
                _const_spec((1, D)),                             # out_proj.bias
                _const_spec((D, F)),                             # linear1.weight^T
                _const_spec((1, F)),                             # linear1.bias
                _const_spec((F, D)),                             # linear2.weight^T
                _const_spec((1, D)),                             # linear2.bias
                _const_spec((1, D)),                             # norm1.weight
                _const_spec((1, D)),                             # norm1.bias
                _const_spec((1, D)),                             # norm2.weight
                _const_spec((1, D)),                             # norm2.bias
            ],
            out_specs=pl.BlockSpec((bt, S, D), lambda b: (b, 0, 0)),
        ),
        compiler_params=pltpu.CompilerParams(
            dimension_semantics=("parallel",),
            vmem_limit_bytes=vmem_limit),
    )(
        x,
        kparams["in_wt"], kparams["in_b"],
        kparams["out_wt"], kparams["out_b"],
        kparams["w1t"], kparams["b1"],
        kparams["w2t"], kparams["b2"],
        kparams["g1"], kparams["bt1"],
        kparams["g2"], kparams["bt2"],
    )
    return out if batch_first else jnp.transpose(out, (1, 0, 2))


def init_params(key, d_model, dim_feedforward):
    """Parameters in PyTorch layout (same shapes as the nn.Module)."""
    ks = jax.random.split(key, 6)
    D, F = d_model, dim_feedforward
    scale = 0.05
    return {
        "in_w":  scale * jax.random.normal(ks[0], (3 * D, D), jnp.float32),
        "in_b":  jnp.zeros((1, 3 * D), jnp.float32),
        "out_w": scale * jax.random.normal(ks[1], (D, D), jnp.float32),
        "out_b": jnp.zeros((1, D), jnp.float32),
        "w1":    scale * jax.random.normal(ks[2], (F, D), jnp.float32),
        "b1":    scale * jax.random.normal(ks[3], (1, F), jnp.float32),
        "w2":    scale * jax.random.normal(ks[4], (D, F), jnp.float32),
        "b2":    scale * jax.random.normal(ks[5], (1, D), jnp.float32),
        "g1":    jnp.ones((1, D), jnp.float32),
        "bt1":   jnp.zeros((1, D), jnp.float32),
        "g2":    jnp.ones((1, D), jnp.float32),
        "bt2":   jnp.zeros((1, D), jnp.float32),
    }


def reference_layer(src, p, *, nhead):
    """Pure-JAX f32 reference matching the PyTorch module (eval mode)."""
    S, B, D = src.shape
    hd = D // nhead
    x = jnp.transpose(src, (1, 0, 2))                               # (B, S, D)
    qkv = jnp.einsum('bsd,ed->bse', x, p["in_w"]) + p["in_b"][0]
    q, k, v = qkv[..., :D], qkv[..., D:2 * D], qkv[..., 2 * D:]

    def split(t):
        return jnp.transpose(t.reshape(B, S, nhead, hd), (0, 2, 1, 3))

    q, k, v = split(q), split(k), split(v)
    s = jnp.einsum('bhqd,bhkd->bhqk', q, k) / math.sqrt(hd)
    pm = jax.nn.softmax(s, axis=-1)
    ctx = jnp.einsum('bhqk,bhkd->bhqd', pm, v)
    ctx = jnp.transpose(ctx, (0, 2, 1, 3)).reshape(B, S, D)
    attn = jnp.einsum('bsd,ed->bse', ctx, p["out_w"]) + p["out_b"][0]
    y = _layernorm(x + attn, p["g1"][0], p["bt1"][0])
    h = jnp.einsum('bsd,fd->bsf', y, p["w1"]) + p["b1"][0]
    h = _gelu_exact(h)
    h2 = jnp.einsum('bsf,df->bsd', h, p["w2"]) + p["b2"][0]
    out = _layernorm(y + h2, p["g2"][0], p["bt2"][0])
    return jnp.transpose(out, (1, 0, 2))                            # (S, B, D)


if __name__ == "__main__":
    # lane-dense small demo: head_dim = 128, d_model / F multiples of 128
    S, B, D, NHEAD, F = 16, 2, 256, 2, 256

    key = jax.random.PRNGKey(0)
    k_x, k_p = jax.random.split(key)
    src = jax.random.normal(k_x, (S, B, D), jnp.float32)
    params = init_params(k_p, D, F)
    kparams = prepare_kernel_params(params, nhead=NHEAD)

    out = transformer_encoder_layer(src, kparams, nhead=NHEAD)
    jax.block_until_ready(out)
    assert out.shape == (S, B, D)
    assert bool(jnp.all(jnp.isfinite(out)))

    ref = reference_layer(src, params, nhead=NHEAD)
    max_err = float(jnp.max(jnp.abs(out - ref)))
    assert max_err < 5e-2, f"max abs err vs f32 reference: {max_err}"
    print("KERNEL_OK")
</pallas_src>

<mosaic_0001>
module attributes {stable_mosaic.version = 11 : i64} {
  func.func @encoder_layer_kernel(%arg0: i32, %arg1: memref<1x16x256xf32, #tpu.memory_space<vmem>>, %arg2: memref<256x768xbf16, #tpu.memory_space<vmem>>, %arg3: memref<1x768xf32, #tpu.memory_space<vmem>>, %arg4: memref<256x256xbf16, #tpu.memory_space<vmem>>, %arg5: memref<1x256xf32, #tpu.memory_space<vmem>>, %arg6: memref<256x256xbf16, #tpu.memory_space<vmem>>, %arg7: memref<1x256xf32, #tpu.memory_space<vmem>>, %arg8: memref<256x256xbf16, #tpu.memory_space<vmem>>, %arg9: memref<1x256xf32, #tpu.memory_space<vmem>>, %arg10: memref<1x256xf32, #tpu.memory_space<vmem>>, %arg11: memref<1x256xf32, #tpu.memory_space<vmem>>, %arg12: memref<1x256xf32, #tpu.memory_space<vmem>>, %arg13: memref<1x256xf32, #tpu.memory_space<vmem>>, %arg14: memref<1x16x256xf32, #tpu.memory_space<vmem>>) attributes {dimension_semantics = [#tpu.dimension_semantics<parallel>], iteration_bounds = array<i64: 2>, scalar_prefetch = 0 : i64, scratch_operands = 0 : i64, tpu.core_type = #tpu.core_type<tc>, window_params = [{transform_indices = @transform_0, window_bounds = array<i64: 1, 16, 256>}, {pipeline_mode = #tpu.pipeline_mode<synchronous>, transform_indices = @transform_1, window_bounds = array<i64: 256, 768>}, {pipeline_mode = #tpu.pipeline_mode<synchronous>, transform_indices = @transform_2, window_bounds = array<i64: 1, 768>}, {pipeline_mode = #tpu.pipeline_mode<synchronous>, transform_indices = @transform_3, window_bounds = array<i64: 256, 256>}, {pipeline_mode = #tpu.pipeline_mode<synchronous>, transform_indices = @transform_4, window_bounds = array<i64: 1, 256>}, {pipeline_mode = #tpu.pipeline_mode<synchronous>, transform_indices = @transform_5, window_bounds = array<i64: 256, 256>}, {pipeline_mode = #tpu.pipeline_mode<synchronous>, transform_indices = @transform_6, window_bounds = array<i64: 1, 256>}, {pipeline_mode = #tpu.pipeline_mode<synchronous>, transform_indices = @transform_7, window_bounds = array<i64: 256, 256>}, {pipeline_mode = #tpu.pipeline_mode<synchronous>, transform_indices = @transform_8, window_bounds = array<i64: 1, 256>}, {pipeline_mode = #tpu.pipeline_mode<synchronous>, transform_indices = @transform_9, window_bounds = array<i64: 1, 256>}, {pipeline_mode = #tpu.pipeline_mode<synchronous>, transform_indices = @transform_10, window_bounds = array<i64: 1, 256>}, {pipeline_mode = #tpu.pipeline_mode<synchronous>, transform_indices = @transform_11, window_bounds = array<i64: 1, 256>}, {pipeline_mode = #tpu.pipeline_mode<synchronous>, transform_indices = @transform_12, window_bounds = array<i64: 1, 256>}, {transform_indices = @transform_13, window_bounds = array<i64: 1, 16, 256>}]} {
    %c0 = arith.constant 0 : index
    %c0_0 = arith.constant 0 : index
    %c0_1 = arith.constant 0 : index
    %0 = vector.load %arg1[%c0, %c0_0, %c0_1] : memref<1x16x256xf32, #tpu.memory_space<vmem>>, vector<1x16x256xf32>
    %1 = vector.shape_cast %0 : vector<1x16x256xf32> to vector<16x256xf32>
    %2 = arith.truncf %1 : vector<16x256xf32> to vector<16x256xbf16>
    %c0_2 = arith.constant 0 : index
    %c0_3 = arith.constant 0 : index
    %3 = vector.load %arg2[%c0_2, %c0_3] : memref<256x768xbf16, #tpu.memory_space<vmem>>, vector<256x768xbf16>
    %cst = arith.constant dense<0.000000e+00> : vector<16x768xf32>
    %4 = tpu.matmul %2, %3, %cst {dimension_numbers = #tpu.dot_dimension_numbers<[1], [0], [0], [1], [0, 0, 1, 1], [], []>} : vector<16x256xbf16>, vector<256x768xbf16>, vector<16x768xf32> -> vector<16x768xf32>
    %c0_4 = arith.constant 0 : index
    %c0_5 = arith.constant 0 : index
    %5 = vector.load %arg3[%c0_4, %c0_5] : memref<1x768xf32, #tpu.memory_space<vmem>>, vector<1x768xf32>
    %6 = vector.shape_cast %5 : vector<1x768xf32> to vector<768xf32>
    %7 = vector.shape_cast %6 : vector<768xf32> to vector<1x768xf32>
    %8 = vector.broadcast %7 : vector<1x768xf32> to vector<16x768xf32>
    %9 = arith.addf %4, %8 : vector<16x768xf32>
    %10 = vector.extract_strided_slice %9 {offsets = [0, 0], sizes = [16, 256], strides = [1, 1]} : vector<16x768xf32> to vector<16x256xf32>
    %11 = arith.truncf %10 : vector<16x256xf32> to vector<16x256xbf16>
    %12 = vector.shape_cast %11 : vector<16x256xbf16> to vector<1x16x2x128xbf16>
    %13 = tpu.transpose %12, [0, 2, 1, 3] : vector<1x16x2x128xbf16> -> vector<1x2x16x128xbf16>
    %14 = vector.shape_cast %13 : vector<1x2x16x128xbf16> to vector<2x16x128xbf16>
    %15 = vector.extract_strided_slice %9 {offsets = [0, 256], sizes = [16, 256], strides = [1, 1]} : vector<16x768xf32> to vector<16x256xf32>
    %16 = arith.truncf %15 : vector<16x256xf32> to vector<16x256xbf16>
    %17 = vector.shape_cast %16 : vector<16x256xbf16> to vector<1x16x2x128xbf16>
    %18 = tpu.transpose %17, [0, 2, 1, 3] : vector<1x16x2x128xbf16> -> vector<1x2x16x128xbf16>
    %19 = vector.shape_cast %18 : vector<1x2x16x128xbf16> to vector<2x16x128xbf16>
    %20 = vector.extract_strided_slice %9 {offsets = [0, 512], sizes = [16, 256], strides = [1, 1]} : vector<16x768xf32> to vector<16x256xf32>
    %21 = arith.truncf %20 : vector<16x256xf32> to vector<16x256xbf16>
    %22 = vector.shape_cast %21 : vector<16x256xbf16> to vector<1x16x2x128xbf16>
    %23 = tpu.transpose %22, [0, 2, 1, 3] : vector<1x16x2x128xbf16> -> vector<1x2x16x128xbf16>
    %24 = vector.shape_cast %23 : vector<1x2x16x128xbf16> to vector<2x16x128xbf16>
    "tpu.trace_start"() <{level = 10 : i32, message = "bqd,bkd->bqk"}> : () -> ()
    %cst_6 = arith.constant dense<0.000000e+00> : vector<2x16x16xf32>
    %25 = tpu.matmul %14, %19, %cst_6 {dimension_numbers = #tpu.dot_dimension_numbers<[2], [2], [1], [1], [0, 0, 0, 1, 1, 1], [0], [0]>} : vector<2x16x128xbf16>, vector<2x16x128xbf16>, vector<2x16x16xf32> -> vector<2x16x16xf32>
    "tpu.trace_stop"() : () -> ()
    %cst_7 = arith.constant dense<0xFF800000> : vector<2x16xf32>
    %26 = vector.multi_reduction <maximumf>, %25, %cst_7 [2] : vector<2x16x16xf32> to vector<2x16xf32>
    %27 = vector.shape_cast %26 : vector<2x16xf32> to vector<2x16x1xf32>
    %28 = vector.broadcast %27 : vector<2x16x1xf32> to vector<2x16x16xf32>
    %29 = arith.subf %25, %28 : vector<2x16x16xf32>
    %30 = math.exp %29 : vector<2x16x16xf32>
    %cst_8 = arith.constant dense<0.000000e+00> : vector<2x16xf32>
    %31 = vector.multi_reduction <add>, %30, %cst_8 [2] : vector<2x16x16xf32> to vector<2x16xf32>
    %32 = vector.shape_cast %31 : vector<2x16xf32> to vector<2x16x1xf32>
    %33 = tpu.reciprocal %32 {approx = true} : vector<2x16x1xf32> -> vector<2x16x1xf32>
    %34 = vector.broadcast %33 : vector<2x16x1xf32> to vector<2x16x16xf32>
    %35 = arith.mulf %30, %34 : vector<2x16x16xf32>
    %36 = arith.truncf %35 : vector<2x16x16xf32> to vector<2x16x16xbf16>
    "tpu.trace_start"() <{level = 10 : i32, message = "bqk,bkd->bqd"}> : () -> ()
    %cst_9 = arith.constant dense<0.000000e+00> : vector<2x16x128xf32>
    %37 = tpu.matmul %36, %24, %cst_9 {dimension_numbers = #tpu.dot_dimension_numbers<[2], [1], [1], [2], [0, 0, 0, 1, 1, 2], [0], [0]>} : vector<2x16x16xbf16>, vector<2x16x128xbf16>, vector<2x16x128xf32> -> vector<2x16x128xf32>
    "tpu.trace_stop"() : () -> ()
    %38 = vector.shape_cast %37 : vector<2x16x128xf32> to vector<1x2x16x128xf32>
    %39 = tpu.transpose %38, [0, 2, 1, 3] : vector<1x2x16x128xf32> -> vector<1x16x2x128xf32>
    %40 = vector.shape_cast %39 : vector<1x16x2x128xf32> to vector<16x256xf32>
    %41 = arith.truncf %40 : vector<16x256xf32> to vector<16x256xbf16>
    %c0_10 = arith.constant 0 : index
    %c0_11 = arith.constant 0 : index
    %42 = vector.load %arg4[%c0_10, %c0_11] : memref<256x256xbf16, #tpu.memory_space<vmem>>, vector<256x256xbf16>
    %cst_12 = arith.constant dense<0.000000e+00> : vector<16x256xf32>
    %43 = tpu.matmul %41, %42, %cst_12 {dimension_numbers = #tpu.dot_dimension_numbers<[1], [0], [0], [1], [0, 0, 1, 1], [], []>} : vector<16x256xbf16>, vector<256x256xbf16>, vector<16x256xf32> -> vector<16x256xf32>
    %c0_13 = arith.constant 0 : index
    %c0_14 = arith.constant 0 : index
    %44 = vector.load %arg5[%c0_13, %c0_14] : memref<1x256xf32, #tpu.memory_space<vmem>>, vector<1x256xf32>
    %45 = vector.shape_cast %44 : vector<1x256xf32> to vector<256xf32>
    %46 = vector.shape_cast %45 : vector<256xf32> to vector<1x256xf32>
    %47 = vector.broadcast %46 : vector<1x256xf32> to vector<16x256xf32>
    %48 = arith.addf %43, %47 : vector<16x256xf32>
    %49 = arith.addf %1, %48 : vector<16x256xf32>
    %c0_15 = arith.constant 0 : index
    %c0_16 = arith.constant 0 : index
    %50 = vector.load %arg10[%c0_15, %c0_16] : memref<1x256xf32, #tpu.memory_space<vmem>>, vector<1x256xf32>
    %51 = vector.shape_cast %50 : vector<1x256xf32> to vector<256xf32>
    %c0_17 = arith.constant 0 : index
    %c0_18 = arith.constant 0 : index
    %52 = vector.load %arg11[%c0_17, %c0_18] : memref<1x256xf32, #tpu.memory_space<vmem>>, vector<1x256xf32>
    %53 = vector.shape_cast %52 : vector<1x256xf32> to vector<256xf32>
    %cst_19 = arith.constant dense<0.000000e+00> : vector<16xf32>
    %54 = vector.multi_reduction <add>, %49, %cst_19 [1] : vector<16x256xf32> to vector<16xf32>
    %55 = vector.shape_cast %54 : vector<16xf32> to vector<16x1xf32>
    %cst_20 = arith.constant 2.560000e+02 : f32
    %56 = vector.broadcast %cst_20 : f32 to vector<16x1xf32>
    %57 = arith.divf %55, %56 : vector<16x1xf32>
    %58 = vector.broadcast %57 : vector<16x1xf32> to vector<16x256xf32>
    %59 = arith.subf %49, %58 : vector<16x256xf32>
    %60 = arith.mulf %59, %59 : vector<16x256xf32>
    %cst_21 = arith.constant dense<0.000000e+00> : vector<16xf32>
    %61 = vector.multi_reduction <add>, %60, %cst_21 [1] : vector<16x256xf32> to vector<16xf32>
    %62 = vector.shape_cast %61 : vector<16xf32> to vector<16x1xf32>
    %cst_22 = arith.constant 2.560000e+02 : f32
    %63 = vector.broadcast %cst_22 : f32 to vector<16x1xf32>
    %64 = arith.divf %62, %63 : vector<16x1xf32>
    %cst_23 = arith.constant 9.99999974E-6 : f32
    %65 = vector.broadcast %cst_23 : f32 to vector<16x1xf32>
    %66 = arith.addf %64, %65 : vector<16x1xf32>
    %67 = math.rsqrt %66 : vector<16x1xf32>
    %68 = vector.broadcast %67 : vector<16x1xf32> to vector<16x256xf32>
    %69 = arith.mulf %59, %68 : vector<16x256xf32>
    %70 = vector.shape_cast %51 : vector<256xf32> to vector<1x256xf32>
    %71 = vector.broadcast %70 : vector<1x256xf32> to vector<16x256xf32>
    %72 = arith.mulf %69, %71 : vector<16x256xf32>
    %73 = vector.shape_cast %53 : vector<256xf32> to vector<1x256xf32>
    %74 = vector.broadcast %73 : vector<1x256xf32> to vector<16x256xf32>
    %75 = arith.addf %72, %74 : vector<16x256xf32>
    %76 = arith.truncf %75 : vector<16x256xf32> to vector<16x256xbf16>
    %c0_24 = arith.constant 0 : index
    %c0_25 = arith.constant 0 : index
    %77 = vector.load %arg6[%c0_24, %c0_25] : memref<256x256xbf16, #tpu.memory_space<vmem>>, vector<256x256xbf16>
    %cst_26 = arith.constant dense<0.000000e+00> : vector<16x256xf32>
    %78 = tpu.matmul %76, %77, %cst_26 {dimension_numbers = #tpu.dot_dimension_numbers<[1], [0], [0], [1], [0, 0, 1, 1], [], []>} : vector<16x256xbf16>, vector<256x256xbf16>, vector<16x256xf32> -> vector<16x256xf32>
    %c0_27 = arith.constant 0 : index
    %c0_28 = arith.constant 0 : index
    %79 = vector.load %arg7[%c0_27, %c0_28] : memref<1x256xf32, #tpu.memory_space<vmem>>, vector<1x256xf32>
    %80 = vector.shape_cast %79 : vector<1x256xf32> to vector<256xf32>
    %81 = vector.shape_cast %80 : vector<256xf32> to vector<1x256xf32>
    %82 = vector.broadcast %81 : vector<1x256xf32> to vector<16x256xf32>
    %83 = arith.addf %78, %82 : vector<16x256xf32>
    %cst_29 = arith.constant 5.000000e-01 : f32
    %84 = vector.broadcast %cst_29 : f32 to vector<16x256xf32>
    %85 = arith.mulf %84, %83 : vector<16x256xf32>
    %cst_30 = arith.constant 0.707106769 : f32
    %86 = vector.broadcast %cst_30 : f32 to vector<16x256xf32>
    %87 = arith.mulf %83, %86 : vector<16x256xf32>
    %88 = math.erf %87 : vector<16x256xf32>
    %cst_31 = arith.constant 1.000000e+00 : f32
    %89 = vector.broadcast %cst_31 : f32 to vector<16x256xf32>
    %90 = arith.addf %89, %88 : vector<16x256xf32>
    %91 = arith.mulf %85, %90 : vector<16x256xf32>
    %92 = arith.truncf %91 : vector<16x256xf32> to vector<16x256xbf16>
    %c0_32 = arith.constant 0 : index
    %c0_33 = arith.constant 0 : index
    %93 = vector.load %arg8[%c0_32, %c0_33] : memref<256x256xbf16, #tpu.memory_space<vmem>>, vector<256x256xbf16>
    %cst_34 = arith.constant dense<0.000000e+00> : vector<16x256xf32>
    %94 = tpu.matmul %92, %93, %cst_34 {dimension_numbers = #tpu.dot_dimension_numbers<[1], [0], [0], [1], [0, 0, 1, 1], [], []>} : vector<16x256xbf16>, vector<256x256xbf16>, vector<16x256xf32> -> vector<16x256xf32>
    %c0_35 = arith.constant 0 : index
    %c0_36 = arith.constant 0 : index
    %95 = vector.load %arg9[%c0_35, %c0_36] : memref<1x256xf32, #tpu.memory_space<vmem>>, vector<1x256xf32>
    %96 = vector.shape_cast %95 : vector<1x256xf32> to vector<256xf32>
    %97 = vector.shape_cast %96 : vector<256xf32> to vector<1x256xf32>
    %98 = vector.broadcast %97 : vector<1x256xf32> to vector<16x256xf32>
    %99 = arith.addf %94, %98 : vector<16x256xf32>
    %100 = arith.addf %75, %99 : vector<16x256xf32>
    %c0_37 = arith.constant 0 : index
    %c0_38 = arith.constant 0 : index
    %101 = vector.load %arg12[%c0_37, %c0_38] : memref<1x256xf32, #tpu.memory_space<vmem>>, vector<1x256xf32>
    %102 = vector.shape_cast %101 : vector<1x256xf32> to vector<256xf32>
    %c0_39 = arith.constant 0 : index
    %c0_40 = arith.constant 0 : index
    %103 = vector.load %arg13[%c0_39, %c0_40] : memref<1x256xf32, #tpu.memory_space<vmem>>, vector<1x256xf32>
    %104 = vector.shape_cast %103 : vector<1x256xf32> to vector<256xf32>
    %cst_41 = arith.constant dense<0.000000e+00> : vector<16xf32>
    %105 = vector.multi_reduction <add>, %100, %cst_41 [1] : vector<16x256xf32> to vector<16xf32>
    %106 = vector.shape_cast %105 : vector<16xf32> to vector<16x1xf32>
    %cst_42 = arith.constant 2.560000e+02 : f32
    %107 = vector.broadcast %cst_42 : f32 to vector<16x1xf32>
    %108 = arith.divf %106, %107 : vector<16x1xf32>
    %109 = vector.broadcast %108 : vector<16x1xf32> to vector<16x256xf32>
    %110 = arith.subf %100, %109 : vector<16x256xf32>
    %111 = arith.mulf %110, %110 : vector<16x256xf32>
    %cst_43 = arith.constant dense<0.000000e+00> : vector<16xf32>
    %112 = vector.multi_reduction <add>, %111, %cst_43 [1] : vector<16x256xf32> to vector<16xf32>
    %113 = vector.shape_cast %112 : vector<16xf32> to vector<16x1xf32>
    %cst_44 = arith.constant 2.560000e+02 : f32
    %114 = vector.broadcast %cst_44 : f32 to vector<16x1xf32>
    %115 = arith.divf %113, %114 : vector<16x1xf32>
    %cst_45 = arith.constant 9.99999974E-6 : f32
    %116 = vector.broadcast %cst_45 : f32 to vector<16x1xf32>
    %117 = arith.addf %115, %116 : vector<16x1xf32>
    %118 = math.rsqrt %117 : vector<16x1xf32>
    %119 = vector.broadcast %118 : vector<16x1xf32> to vector<16x256xf32>
    %120 = arith.mulf %110, %119 : vector<16x256xf32>
    %121 = vector.shape_cast %102 : vector<256xf32> to vector<1x256xf32>
    %122 = vector.broadcast %121 : vector<1x256xf32> to vector<16x256xf32>
    %123 = arith.mulf %120, %122 : vector<16x256xf32>
    %124 = vector.shape_cast %104 : vector<256xf32> to vector<1x256xf32>
    %125 = vector.broadcast %124 : vector<1x256xf32> to vector<16x256xf32>
    %126 = arith.addf %123, %125 : vector<16x256xf32>
    %127 = vector.shape_cast %126 : vector<16x256xf32> to vector<1x16x256xf32>
    %c0_46 = arith.constant 0 : index
    %c0_47 = arith.constant 0 : index
    %c0_48 = arith.constant 0 : index
    %128 = vector.load %arg14[%c0_46, %c0_47, %c0_48] : memref<1x16x256xf32, #tpu.memory_space<vmem>>, vector<1x16x256xf32>
    tpu.vector_store %arg14[%c0_46, %c0_47, %c0_48], %127 {strides = array<i32>} : memref<1x16x256xf32, #tpu.memory_space<vmem>>, vector<1x16x256xf32>,
    return
  }
  func.func @transform_0(%arg0: i32) -> (i32, i32, i32) {
    %c0_i32 = arith.constant 0 : i32
    %c0_i32_0 = arith.constant 0 : i32
    %c0_i32_1 = arith.constant 0 : i32
    return %arg0, %c0_i32, %c0_i32_0 : i32, i32, i32
  }
  func.func @transform_1(%arg0: i32) -> (i32, i32) {
    %c0_i32 = arith.constant 0 : i32
    %c0_i32_0 = arith.constant 0 : i32
    %c0_i32_1 = arith.constant 0 : i32
    return %c0_i32, %c0_i32_0 : i32, i32
  }
  func.func @transform_2(%arg0: i32) -> (i32, i32) {
    %c0_i32 = arith.constant 0 : i32
    %c0_i32_0 = arith.constant 0 : i32
    %c0_i32_1 = arith.constant 0 : i32
    return %c0_i32, %c0_i32_0 : i32, i32
  }
  func.func @transform_3(%arg0: i32) -> (i32, i32) {
    %c0_i32 = arith.constant 0 : i32
    %c0_i32_0 = arith.constant 0 : i32
    %c0_i32_1 = arith.constant 0 : i32
    return %c0_i32, %c0_i32_0 : i32, i32
  }
  func.func @transform_4(%arg0: i32) -> (i32, i32) {
    %c0_i32 = arith.constant 0 : i32
    %c0_i32_0 = arith.constant 0 : i32
    %c0_i32_1 = arith.constant 0 : i32
    return %c0_i32, %c0_i32_0 : i32, i32
  }
  func.func @transform_5(%arg0: i32) -> (i32, i32) {
    %c0_i32 = arith.constant 0 : i32
    %c0_i32_0 = arith.constant 0 : i32
    %c0_i32_1 = arith.constant 0 : i32
    return %c0_i32, %c0_i32_0 : i32, i32
  }
  func.func @transform_6(%arg0: i32) -> (i32, i32) {
    %c0_i32 = arith.constant 0 : i32
    %c0_i32_0 = arith.constant 0 : i32
    %c0_i32_1 = arith.constant 0 : i32
    return %c0_i32, %c0_i32_0 : i32, i32
  }
  func.func @transform_7(%arg0: i32) -> (i32, i32) {
    %c0_i32 = arith.constant 0 : i32
    %c0_i32_0 = arith.constant 0 : i32
    %c0_i32_1 = arith.constant 0 : i32
    return %c0_i32, %c0_i32_0 : i32, i32
  }
  func.func @transform_8(%arg0: i32) -> (i32, i32) {
    %c0_i32 = arith.constant 0 : i32
    %c0_i32_0 = arith.constant 0 : i32
    %c0_i32_1 = arith.constant 0 : i32
    return %c0_i32, %c0_i32_0 : i32, i32
  }
  func.func @transform_9(%arg0: i32) -> (i32, i32) {
    %c0_i32 = arith.constant 0 : i32
    %c0_i32_0 = arith.constant 0 : i32
    %c0_i32_1 = arith.constant 0 : i32
    return %c0_i32, %c0_i32_0 : i32, i32
  }
  func.func @transform_10(%arg0: i32) -> (i32, i32) {
    %c0_i32 = arith.constant 0 : i32
    %c0_i32_0 = arith.constant 0 : i32
    %c0_i32_1 = arith.constant 0 : i32
    return %c0_i32, %c0_i32_0 : i32, i32
  }
  func.func @transform_11(%arg0: i32) -> (i32, i32) {
    %c0_i32 = arith.constant 0 : i32
    %c0_i32_0 = arith.constant 0 : i32
    %c0_i32_1 = arith.constant 0 : i32
    return %c0_i32, %c0_i32_0 : i32, i32
  }
  func.func @transform_12(%arg0: i32) -> (i32, i32) {
    %c0_i32 = arith.constant 0 : i32
    %c0_i32_0 = arith.constant 0 : i32
    %c0_i32_1 = arith.constant 0 : i32
    return %c0_i32, %c0_i32_0 : i32, i32
  }
  func.func @transform_13(%arg0: i32) -> (i32, i32, i32) {
    %c0_i32 = arith.constant 0 : i32
    %c0_i32_0 = arith.constant 0 : i32
    %c0_i32_1 = arith.constant 0 : i32
    return %arg0, %c0_i32, %c0_i32_0 : i32, i32, i32
  }
}

</mosaic_0001>

<bundles_post_ra>
// kernel: tpu_custom_call.1
= control target key start
LH: loop header
LB: loop body
LE: loop exit
PB: predicated region body
PF: predicated region fallthrough
CT: control target
= control target key end

     0   :  { %s4944_s0 = inlined_call_operand.hbm [shape: f32[2,16,256], index: 0, kind: input, shape index: {}]   ;;  %s4945_s1 = inlined_call_operand.hbm [shape: bf16[256,768], index: 1, kind: input, shape index: {}]   ;;  %s4946_s2 = inlined_call_operand.hbm [shape: f32[1,768], index: 2, kind: input, shape index: {}]   ;;  %s4947_s3 = inlined_call_operand.hbm [shape: bf16[256,256], index: 3, kind: input, shape index: {}]   ;;  %s4948_s4 = inlined_call_operand.vmem [shape: f32[1,256], index: 4, kind: input, shape index: {}]   ;;  %s4949_s5 = inlined_call_operand.hbm [shape: bf16[256,256], index: 5, kind: input, shape index: {}]   ;;  %s4950_s6 = inlined_call_operand.vmem [shape: f32[1,256], index: 6, kind: input, shape index: {}]   ;;  %s4951_s7 = inlined_call_operand.hbm [shape: bf16[256,256], index: 7, kind: input, shape index: {}]   ;;  %s4952_s8 = inlined_call_operand.vmem [shape: f32[1,256], index: 8, kind: input, shape index: {}]   ;;  %s4953_s9 = inlined_call_operand.vmem [shape: f32[1,256], index: 9, kind: input, shape index: {}]   ;;  %s4954_s10 = inlined_call_operand.vmem [shape: f32[1,256], index: 10, kind: input, shape index: {}]   ;;  %s4955_s11 = inlined_call_operand.vmem [shape: f32[1,256], index: 11, kind: input, shape index: {}]   ;;  %s4956_s12 = inlined_call_operand.vmem [shape: f32[1,256], index: 12, kind: input, shape index: {}]   ;;  %s4957_s13 = inlined_call_operand.hbm [shape: f32[2,16,256], index: 13, kind: output, shape index: {}]  }
   0x1   :  { %4965 = sst [smem:[#allocation20_spill]] %s4945_s1 }
   0x2   :  { %4966 = sst [smem:[#allocation21_spill]] %s4946_s2 }
   0x3   :  { %4967 = sst [smem:[#allocation22_spill]] %s4947_s3 }
   0x4   :  { %4968 = sst [smem:[#allocation23_spill]] %s4949_s5 }
   0x5   :  { %4969 = sst [smem:[#allocation24_spill]] %s4951_s7 }
   0x6   :  { %4970 = sst [smem:[#allocation25_spill]] %s4957_s13 }
   0x7   :  { %18 = vsyncpa [#allocation3], 0 }
   0x8   :  { %20 = vsyncpa [#allocation3 + $0x1], 0 }
   0x9   :  { %21 = vsyncpa [#allocation6], 0 }
   0xa   :  { %22 = vsyncpa [#allocation9], 0 }
   0xb   :  { %23 = vsyncpa [#allocation12], 0 }
   0xc   :  { %24 = vsyncpa [#allocation4], 0 }
   0xd   :  { %26 = vsyncpa [#allocation4 + $0x1], 0  ;;  %s4442_s25 = smov 0   ;;  %s4444_s26 = smov 0  }
   0xe   :  { %s4446_s27 = smov 0   ;;  %s4448_s28 = smov 0  }
   0xf LB: > { %s4352_s29 = smov [#allocation5]   ;;  %s4463_s14 = sadd.s32 4294967295, %s4350_s28   ;;  %s4350_s28 = sphi %s4448_s28, %s5001_s28   ;;  %s4346_s27 = sphi %s4446_s27, %s5000_s27   ;;  %s4342_s26 = sphi %s4444_s26, %s4999_s26   ;;  %s4338_s25 = sphi %s4442_s25, %s4998_s25  }
  0x10   : > { %s353_s30 = sshll.u32 %s4352_s29, 4  ;;  %p3415_p0 = scmp.ge.s32.totalorder %s4350_s28, 1  ;;  %s354_s30 = int_to_ptr.vmem [resolvable:$true] %s353_s30 }
  0x11   : > { %p4961_p1 = scmp.eq.s32.totalorder %s4463_s14, 0  ;;  %p341_p2 = scmp.lt.s32.totalorder %s4350_s28, 3 }
  0x12   : > { %s4353_s16 = smov [#allocation8]   ;;  %s4354_s19 = smov [#allocation7]  }
  0x13   : > { %p4468_p3 = pnand %p3415_p0, %p341_p2  ;;  %s377_s17 = sshll.u32 %s4353_s16, 4  ;;  %s4481_s17 = int_to_ptr.vmem [resolvable:$true] %s377_s17 }
  0x14   : > { %s4483_s20 = sshll.u32 %s4354_s19, 4  ;;  %s4127_s22 = scalar_lea.vmem %s354_s30, 12288  ;;  %s368_s20 = int_to_ptr.vmem [resolvable:$true] %s4483_s20 }
  0x15   : > { %s4971_s15 = scalar_select %p4468_p3, 1, 0 }
  0x16   : > { %p3706_p5 = pneg %p4468_p3  ;;  %p4128_p8 = scmp.ne.s32.totalorder %s354_s30, %s4127_s22 }
  0x17   : > { %p4135_p11 = scmp.lt.s32.totalorder %s354_s30, %s354_s30  ;;  %p4136_p12 = scmp.lt.s32.totalorder %s4127_s22, %s4127_s22 }
  0x18   : > { %p4477_p6 = pnand %p3706_p5, %p4961_p1 }
  0x19   : > { %p4137_p13 = por %p4136_p12, %p4135_p11 }
  0x1a   : > { %p4487_p7 = pneg %p4477_p6 }
  0x1c   : > { %p4130_p9 = pnand %p4128_p8, %p4487_p7 }
  0x1e   : > { %p4131_p10 = pneg %p4130_p9 }
  0x20   : > { %p4138_p0 = pnand %p4137_p13, %p4131_p10 }
  0x22   : > { %4141 = shalt.err (!%p4138_p0)
}
  0x23   : > { %s4355_s23 = smov 384   ;;  %s4356_s24 = smov 24  }
  0x24   : > { %s4974_s1 = sld [smem:[#allocation20_spill]]  ;;  %s4153_s19 = scalar_lea.vmem %s4481_s17, 4096 }
  0x25   : > { %p4154_p2 = scmp.ne.s32.totalorder %s4481_s17, %s4153_s19  ;;  %p4161_p9 = scmp.lt.s32.totalorder %s4481_s17, %s4481_s17 }
  0x26   : > { %p4162_p10 = scmp.lt.s32.totalorder %s4153_s19, %s4153_s19 }
  0x27   : > { %p4156_p5 = pnand %p4154_p2, %p4487_p7 }
  0x28   : > { %p4163_p11 = por %p4162_p10, %p4161_p9 }
  0x29   : > { %p4157_p8 = pneg %p4156_p5 }
  0x2a   : > { %3709 = dma.hbm_to_vmem [thread:$0]  (!%p4477_p6), %s4974_s1, 12288, %s354_s30, [#allocation6], %s4355_s23, %s4355_s23, %s4356_s24  }
  0x2b   : > { %p4164_p12 = pnand %p4163_p11, %p4157_p8 }
  0x2d   : > { %4167 = shalt.err (!%p4164_p12)
}
  0x2e   : > { %s4959_s22 = smov 128   ;;  %s4358_s13 = smov 8  }
  0x2f   : > { %s4975_s3 = sld [smem:[#allocation22_spill]]  ;;  %s4179_s24 = scalar_lea.vmem %s368_s20, 96 }
  0x30   : > { %p4180_p13 = scmp.ne.s32.totalorder %s368_s20, %s4179_s24  ;;  %p4187_p5 = scmp.lt.s32.totalorder %s368_s20, %s368_s20 }
  0x31   : > { %p4188_p8 = scmp.lt.s32.totalorder %s4179_s24, %s4179_s24 }
  0x32   : > { %p4182_p0 = pnand %p4180_p13, %p4487_p7 }
  0x33   : > { %p4189_p9 = por %p4188_p8, %p4187_p5 }
  0x34   : > { %p4183_p2 = pneg %p4182_p0 }
  0x35   : > { %3715 = dma.hbm_to_vmem [thread:$0]  (!%p4477_p6), %s4975_s3, 4096, %s4481_s17, [#allocation9], %s4959_s22, %s4959_s22, %s4358_s13  }
  0x36   : > { %p4190_p10 = pnand %p4189_p9, %p4183_p2 }
  0x38   : > { %4193 = shalt.err (!%p4190_p10)
}
  0x39   : > { %s4976_s2 = sld [smem:[#allocation21_spill]]  ;;  %s4359_s19 = smov [#allocation10]  }
  0x3a   : > { %s393_s17 = sshll.u32 %s4359_s19, 4  ;;  %s4360_s30 = smov [#allocation11]   ;;  %s394_s17 = int_to_ptr.vmem [resolvable:$true] %s393_s17 }
  0x3b   : > { %s409_s23 = sshll.u32 %s4360_s30, 4  ;;  %s4205_s22 = scalar_lea.vmem %s394_s17, 4096  ;;  %s410_s23 = int_to_ptr.vmem [resolvable:$true] %s409_s23 }
  0x3c   : > { %p4206_p11 = scmp.ne.s32.totalorder %s394_s17, %s4205_s22  ;;  %p4213_p0 = scmp.lt.s32.totalorder %s394_s17, %s394_s17 }
  0x3d   : > { %p4214_p2 = scmp.lt.s32.totalorder %s4205_s22, %s4205_s22 }
  0x3e   : > { %p4208_p12 = pnand %p4206_p11, %p4487_p7 }
  0x3f   : > { %3712 = dma.hbm_to_vmem [thread:$0]  (!%p4477_p6), %s4976_s2, 96, %s368_s20, [#allocation6]  }
  0x40   : > { %p4209_p13 = pneg %p4208_p12  ;;  %p4215_p5 = por %p4214_p2, %p4213_p0 }
  0x42   : > { %p4216_p8 = pnand %p4215_p5, %p4209_p13 }
  0x44   : > { %4219 = shalt.err (!%p4216_p8)
}
  0x45   : > { %s4977_s24 = smov 128   ;;  %s4978_s5 = sld [smem:[#allocation23_spill]] }
  0x46   : > { %s4231_s16 = scalar_lea.vmem %s410_s23, 4096  ;;  %p4239_p12 = scmp.lt.s32.totalorder %s410_s23, %s410_s23 }
  0x47   : > { %p4232_p9 = scmp.ne.s32.totalorder %s410_s23, %s4231_s16  ;;  %p4240_p0 = scmp.lt.s32.totalorder %s4231_s16, %s4231_s16 }
  0x49   : > { %p4234_p10 = pnand %p4232_p9, %p4487_p7  ;;  %p4241_p13 = por %p4240_p0, %p4239_p12 }
  0x4b   : > { %3718 = dma.hbm_to_vmem [thread:$0]  (!%p4477_p6), %s4978_s5, 4096, %s394_s17, [#allocation9], %s4977_s24, %s4977_s24, %s4358_s13  }
  0x4c   : > { %p4235_p11 = pneg %p4234_p10 }
  0x4e   : > { %p4242_p2 = pnand %p4241_p13, %p4235_p11 }
  0x50   : > { %4245 = shalt.err (!%p4242_p2)
}
  0x51   : > { %s4979_s7 = sld [smem:[#allocation24_spill]]  ;;  %s3414_s18 = sadd.s32 4294967294, %s4350_s28  }
  0x52   : > { %s4543_s21 = sadd.s32 1, %s4350_s28   ;;  %s39_s17 = sadd.s32 1, %s4346_s27 }
  0x53   : > { %s36_s30 = ssub.s32 %s4350_s28, %s4543_s21  ;;  %p46_p7 = scmp.ne.s32.totalorder %s4346_s27, %s4342_s26 }
  0x54   : > { %p37_p5 = scmp.eq.s32.totalorder %s36_s30, 0  ;;  %p47_p8 = scmp.eq.s32.totalorder %s4350_s28, 0 }
  0x55   : > { %p52_p9 = scmp.ne.s32.totalorder %s4342_s26, %s4338_s25  ;;  %p328_p10 = scmp.eq.s32.totalorder %s4463_s14, 1 }
  0x56   : > { %s4555_s20 = scalar_select %p37_p5, %s4346_s27, %s39_s17  }
  0x57   : > { %3721 = dma.hbm_to_vmem [thread:$0]  (!%p4477_p6), %s4979_s7, 4096, %s410_s23, [#allocation12], %s4977_s24, %s4977_s24, %s4358_s13  }
  0x58   : > { %4980 = sst [smem:[#allocation19_spill]] %s4555_s20  ;;  %p48_p11 = por %p47_p8, %p46_p7 }
  0x59   : > { %p4559_p12 = por %p4961_p1, %p52_p9  ;;  %p4563_p6 = por %p328_p10, %p46_p7 }
  0x5a   : > { %p334_p0 = scmp.eq.s32.totalorder %s3414_s18, 1  ;;  %p3735_p13 = scmp.lt.s32.totalorder %s4350_s28, 2 }
  0x5b   : > { %s4981_s29 = scalar_select %p4559_p12, 1, 0 }
  0x5c   : > { %s4982_s13 = scalar_select %p4563_p6, 1, 0 }
  0x5d   : > { %s438_s23 = sand.u32 1, %s4346_s27   ;;  %p4569_p2 = por %p334_p0, %p52_p9 }
  0x5e   : > { %s3422_s16 = sshll.u32 %s438_s23, 5  ;;  %s3648_s22 = sshll.u32 %s4350_s28, 9 }
  0x5f   : > { %s4983_s24 = scalar_select %p4569_p2, 1, 0 }
  0x60   : > { %s4577_s30 = scalar_lea.hbm %s4944_s0, %s3648_s22  ;;  %s442_s1 = scalar_lea.vmem [#allocation2], %s3422_s16 }
  0x61   : > { %s449_s2 = sshll.u32 %s442_s1, 4  ;;  %p4579_p7 = pnand %p3735_p13, %p48_p11  ;;  %s4583_s2 = int_to_ptr.vmem [resolvable:$true] %s449_s2 }
  0x62   : > { %s4585_s3 = scalar_lea.sflag [#allocation3], %s438_s23  ;;  %s4246_s5 = scalar_lea.hbm %s4577_s30, 512 }
  0x63   : > { %p4247_p5 = scmp.ne.s32.totalorder %s4577_s30, %s4246_s5  ;;  %p4248_p8 = pneg %p4579_p7 }
  0x64   : > { %s4251_s16 = scalar_lea.hbm %s4944_s0, 1024  ;;  %p4252_p11 = scmp.lt.s32.totalorder %s4577_s30, %s4944_s0 }
  0x65   : > { %p4249_p9 = pnand %p4248_p8, %p4247_p5  ;;  %p4253_p0 = scmp.lt.s32.totalorder %s4251_s16, %s4246_s5 }
  0x67   : > { %p4250_p10 = pneg %p4249_p9  ;;  %p4254_p13 = por %p4253_p0, %p4252_p11 }
  0x69   : > { %p4255_p4 = pnand %p4254_p13, %p4250_p10 }
  0x6b   : > { %4258 = shalt.err (!%p4255_p4)
}
  0x6c   : > { %s4259_s23 = scalar_lea.vmem %s4583_s2, 512  ;;  %s4361_s7 = smov [#allocation2]  }
  0x6d   : > { %p4260_p1 = scmp.ne.s32.totalorder %s4583_s2, %s4259_s23  ;;  %s4264_s20 = sshll.u32 %s4361_s7, 4  ;;  %s4265_s20 = int_to_ptr.vmem [resolvable:$false] %s4264_s20 }
  0x6e   : > { %s4266_s22 = scalar_lea.vmem %s4265_s20, 1024  ;;  %p4267_p9 = scmp.lt.s32.totalorder %s4583_s2, %s4265_s20 }
  0x6f   : > { %p4262_p2 = pnand %p4260_p1, %p4248_p8  ;;  %p4268_p6 = scmp.lt.s32.totalorder %s4266_s22, %s4259_s23 }
  0x71   : > { %p4263_p5 = pneg %p4262_p2  ;;  %p4269_p12 = por %p4268_p6, %p4267_p9 }
  0x73   : > { %p4270_p3 = pnand %p4269_p12, %p4263_p5 }
  0x75   : > { %4273 = shalt.err (!%p4270_p3)
}
  0x76   : > { %s4362_s5 = smov 256   ;;  %s4363_s19 = smov 16  }
  0x77   : > { %3725 = dma.hbm_to_vmem [thread:$0]  (!%p4579_p7), %s4577_s30, 512, %s4583_s2, %s4585_s3, %s4362_s5, %s4362_s5, %s4363_s19  }
  0x78   : > { %p4985_p1 = scmp.ne.s32.totalorder %s4971_s15, 0 }
  0x79   : > { %s4609_s7 = sand.u32 (!%p4985_p1), 1, %s4342_s26   ;;  %p4986_p3 = scmp.ne.s32.totalorder (!%p4985_p1), %s4981_s29, 0 }
  0x7a   : > { %461 = sbr.rel (%p4985_p1) target bundleno = 2446 (0x98e), region = 72  ;;  %s3426_s20 = sshll.u32 (!%p4985_p1), %s4609_s7, 5 }
  0x7b   : > { %s464_s16 = scalar_lea.sflag (!%p4985_p1), [#allocation3], %s4609_s7  ;;  %s4615_s1 = scalar_lea.vmem (!%p4985_p1), [#allocation2], %s3426_s20 }
  0x7f   : > { %4317 = dma.done.wait (%p4986_p3), %s464_s16, 512  }
  0x80   : > { %4319 = vsyncadd (%p4986_p3), %s464_s16, 4294966784  ;;  %p4987_p4 = scmp.eq.s32.totalorder %s4463_s14, 0 }
  0x82   : > { %4321 = dma.done.wait (%p4987_p4), [#allocation6], 12384   ;;  %p4988_p12 = pmov %p4987_p4 }
  0x83   : > { %p4989_p6 = pmov %p4987_p4 }
  0x84   : > { %4323 = vsyncadd (%p4988_p12), [#allocation6], 4294954912 }
  0x85   : > { %4325 = dma.done.wait (%p4989_p6), [#allocation9], 8192   ;;  %p4990_p2 = pmov %p4987_p4 }
  0x87   : > { %4327 = vsyncadd (%p4990_p2), [#allocation9], 4294959104  ;;  %p4991_p7 = pmov %p4990_p2 }
  0x88   : > { %p4992_p8 = pmov %p4990_p2 }
  0x89   : > { %4329 = dma.done.wait (%p4991_p7), [#allocation12], 4096  }
  0x8a   : > { %4331 = vsyncadd (%p4992_p8), [#allocation12], 4294963200  ;;  %v3792_v0 = vld [vmem:[#allocation5 + $0x154] ss:$24 sps:$4 sm:$0xff]   ;;  %v3796_v2 = vld [vmem:[#allocation5 + $0x150] ss:$24 sps:$4 sm:$0xff]  }
  0x8b   : > { %v3794_v1 = vld [vmem:[#allocation5 + $0x15c] ss:$24 sps:$4 sm:$0xff]   ;;  %1145 = vmatprep.subr.bf16.mxu0 %v3792_v0  ;;  %v3797_v3 = vld [vmem:[#allocation5 + $0x158] ss:$24 sps:$4 sm:$0xff]   ;;  %v3800_v5 = vld [vmem:[#allocation5 + $0x12c] ss:$24 sps:$4 sm:$0xff]  }
  0x8c   : > { %1188 = vmatprep.subr.bf16.mxu1 %v3794_v1  ;;  %v3798_v4 = vld [vmem:[#allocation5 + $0x124] ss:$24 sps:$4 sm:$0xff]   ;;  %1146 = vmatpush1.bf16.msra.mxu0 %v3796_v2  ;;  %v3802_v6 = vld [vmem:[#allocation5 + $0x120] ss:$24 sps:$4 sm:$0xff]   ;;  %v3804_v8 = vld [vmem:[#allocation5 + $0xf4] ss:$24 sps:$4 sm:$0xff]  }
  0x8d   : > { %1189 = vmatpush1.bf16.msra.mxu1 %v3797_v3  ;;  %1147 = vmatprep.subr.bf16.mxu0 %v3798_v4  ;;  %v3803_v7 = vld [vmem:[#allocation5 + $0x128] ss:$24 sps:$4 sm:$0xff]   ;;  %v3806_v9 = vld [vmem:[#allocation5 + $0xfc] ss:$24 sps:$4 sm:$0xff]   ;;  %v3809_v11 = vld [vmem:[#allocation5 + $0xf8] ss:$24 sps:$4 sm:$0xff]  }
  0x8e   : > { %1190 = vmatprep.subr.bf16.mxu1 %v3800_v5  ;;  %v3808_v10 = vld [vmem:[#allocation5 + $0xf0] ss:$24 sps:$4 sm:$0xff]   ;;  %v3810_v12 = vld [vmem:[#allocation5 + $0xc4] ss:$24 sps:$4 sm:$0xff]   ;;  %v3814_v14 = vld [vmem:[#allocation5 + $0xc0] ss:$24 sps:$4 sm:$0xff]  }
  0x8f   : > { %v3812_v13 = vld [vmem:[#allocation5 + $0xcc] ss:$24 sps:$4 sm:$0xff]   ;;  %v3815_v15 = vld [vmem:[#allocation5 + $0xc8] ss:$24 sps:$4 sm:$0xff]   ;;  %v3818_v17 = vld [vmem:[#allocation5 + $0x9c] ss:$24 sps:$4 sm:$0xff]  }
  0x90   : > { %1148 = vmatpush1.bf16.msra.mxu0 %v3802_v6  ;;  %v3816_v16 = vld [vmem:[#allocation5 + $0x94] ss:$24 sps:$4 sm:$0xff]   ;;  %v3820_v18 = vld [vmem:[#allocation5 + $0x90] ss:$24 sps:$4 sm:$0xff]   ;;  %v3822_v20 = vld [vmem:[#allocation5 + $0x64] ss:$24 sps:$4 sm:$0xff]  }
  0x91   : > { %1191 = vmatpush1.bf16.msra.mxu1 %v3803_v7  ;;  %1149 = vmatprep.subr.bf16.mxu0 %v3804_v8  ;;  %v3821_v19 = vld [vmem:[#allocation5 + $0x98] ss:$24 sps:$4 sm:$0xff]   ;;  %v3824_v21 = vld [vmem:[#allocation5 + $0x6c] ss:$24 sps:$4 sm:$0xff]   ;;  %v3827_v23 = vld [vmem:[#allocation5 + $0x68] ss:$24 sps:$4 sm:$0xff]  }
  0x92   : > { %1192 = vmatprep.subr.bf16.mxu1 %v3806_v9  ;;  %v3826_v22 = vld [vmem:[#allocation5 + $0x60] ss:$24 sps:$4 sm:$0xff]   ;;  %v3828_v24 = vld [vmem:[#allocation5 + $0x34] ss:$24 sps:$4 sm:$0xff]   ;;  %v3832_v26 = vld [vmem:[#allocation5 + $0x30] ss:$24 sps:$4 sm:$0xff]  }
  0x93   : > { %v3830_v25 = vld [vmem:[#allocation5 + $0x3c] ss:$24 sps:$4 sm:$0xff]   ;;  %v3833_v27 = vld [vmem:[#allocation5 + $0x38] ss:$24 sps:$4 sm:$0xff]   ;;  %v3836_v29 = vld [vmem:[#allocation5 + $0xc] ss:$24 sps:$4 sm:$0xff]  }
  0x94   : > { %1150 = vmatpush1.bf16.msra.mxu0 %v3808_v10  ;;  %v3834_v28 = vld [vmem:[#allocation5 + $0x4] ss:$24 sps:$4 sm:$0xff]   ;;  %v3838_v30 = vld [vmem:[#allocation5] ss:$24 sps:$4 sm:$0xff]   ;;  %v3840_v32 = vld [vmem:[#allocation5 + $0x2d4] ss:$24 sps:$4 sm:$0xff]  }
  0x95   : > { %1193 = vmatpush1.bf16.msra.mxu1 %v3809_v11  ;;  %1151 = vmatprep.subr.bf16.mxu0 %v3810_v12  ;;  %v3839_v31 = vld [vmem:[#allocation5 + $0x8] ss:$24 sps:$4 sm:$0xff]   ;;  %v3842_v33 = vld [vmem:[#allocation5 + $0x2dc] ss:$24 sps:$4 sm:$0xff]   ;;  %v3845_v35 = vld [vmem:[#allocation5 + $0x2d8] ss:$24 sps:$4 sm:$0xff]  }
  0x96   : > { %1194 = vmatprep.subr.bf16.mxu1 %v3812_v13  ;;  %v3844_v34 = vld [vmem:[#allocation5 + $0x2d0] ss:$24 sps:$4 sm:$0xff]   ;;  %v3846_v36 = vld [vmem:[#allocation5 + $0x2a4] ss:$24 sps:$4 sm:$0xff]   ;;  %v3850_v38 = vld [vmem:[#allocation5 + $0x2a0] ss:$24 sps:$4 sm:$0xff]  }
  0x97   : > { %v3848_v37 = vld [vmem:[#allocation5 + $0x2ac] ss:$24 sps:$4 sm:$0xff]   ;;  %v3851_v39 = vld [vmem:[#allocation5 + $0x2a8] ss:$24 sps:$4 sm:$0xff]   ;;  %v3854_v41 = vld [vmem:[#allocation5 + $0x27c] ss:$24 sps:$4 sm:$0xff]  }
  0x98   : > { %1152 = vmatpush1.bf16.msra.mxu0 %v3814_v14  ;;  %v3852_v40 = vld [vmem:[#allocation5 + $0x274] ss:$24 sps:$4 sm:$0xff]   ;;  %v3856_v42 = vld [vmem:[#allocation5 + $0x270] ss:$24 sps:$4 sm:$0xff]   ;;  %v3858_v44 = vld [vmem:[#allocation5 + $0x244] ss:$24 sps:$4 sm:$0xff]  }
  0x99   : > { %1195 = vmatpush1.bf16.msra.mxu1 %v3815_v15  ;;  %1153 = vmatprep.subr.bf16.mxu0 %v3816_v16  ;;  %v3857_v43 = vld [vmem:[#allocation5 + $0x278] ss:$24 sps:$4 sm:$0xff]   ;;  %v3860_v45 = vld [vmem:[#allocation5 + $0x24c] ss:$24 sps:$4 sm:$0xff]   ;;  %v3863_v48 = vld [vmem:[#allocation5 + $0x248] ss:$24 sps:$4 sm:$0xff]  }
  0x9a   : > { %1196 = vmatprep.subr.bf16.mxu1 %v3818_v17  ;;  %v532_v46 = vld [vmem:[%s4615_s1 + $0x8] sm:$0xff]  ;;  %v3862_v47 = vld [vmem:[#allocation5 + $0x240] ss:$24 sps:$4 sm:$0xff]   ;;  %v3866_v52 = vld [vmem:[#allocation5 + $0x21c] ss:$24 sps:$4 sm:$0xff]   ;;  %vm4365_vm0 = vmmov 0  }
  0x9b   : > { %v534_v49 = vld [vmem:[%s4615_s1 + $0x18] sm:$0xff]  ;;  %v3864_v50 = vld [vmem:[#allocation5 + $0x214] ss:$24 sps:$4 sm:$0xff]   ;;  %v3868_v53 = vld [vmem:[#allocation5 + $0x210] ss:$24 sps:$4 sm:$0xff]   ;;  %vm2004_vm1 = vcmask 130048  }
  0x9c   : > { %1154 = vmatpush1.bf16.msra.mxu0 %v3820_v18  ;;  %v536_v51 = vpack.c.bf16 %v534_v49, %v532_v46  ;;  %v3869_v54 = vld [vmem:[#allocation5 + $0x218] ss:$24 sps:$4 sm:$0xff]   ;;  %v3870_v55 = vld [vmem:[#allocation5 + $0x1e4] ss:$24 sps:$4 sm:$0xff]   ;;  %v3875_v58 = vld [vmem:[#allocation5 + $0x1e8] ss:$24 sps:$4 sm:$0xff]  }
  0x9d   : > { %1197 = vmatpush1.bf16.msra.mxu1 %v3821_v19  ;;  %1155 = vmatprep.subr.bf16.mxu0 %v3822_v20  ;;  %v3872_v56 = vld [vmem:[#allocation5 + $0x1ec] ss:$24 sps:$4 sm:$0xff]   ;;  %v3874_v57 = vld [vmem:[#allocation5 + $0x1e0] ss:$24 sps:$4 sm:$0xff]   ;;  %v3878_v60 = vld [vmem:[#allocation5 + $0x1bc] ss:$24 sps:$4 sm:$0xff]  }
  0x9e   : > { %1198 = vmatprep.subr.bf16.mxu1 %v3824_v21  ;;  %1177 = vmatprep.mubr.bf16.mxu0 %v536_v51  ;;  %v3876_v59 = vld [vmem:[#allocation5 + $0x1b4] ss:$24 sps:$4 sm:$0xff]   ;;  %v3880_v61 = vld [vmem:[#allocation5 + $0x1b0] ss:$24 sps:$4 sm:$0xff]   ;;  %v3882_v63 = vld [vmem:[#allocation5 + $0x184] ss:$24 sps:$4 sm:$0xff]  }
  0x9f   : > { %1220 = vmatprep.mubr.bf16.mxu1 %v536_v51  ;;  %v3881_v62 = vld [vmem:[#allocation5 + $0x1b8] ss:$24 sps:$4 sm:$0xff]   ;;  %v3884_v0 = vld [vmem:[#allocation5 + $0x18c] ss:$24 sps:$4 sm:$0xff]   ;;  %v3887_v2 = vld [vmem:[#allocation5 + $0x188] ss:$24 sps:$4 sm:$0xff]  }
  0xa0   : > { %1156 = vmatpush1.bf16.msra.mxu0 %v3826_v22  ;;  %v3886_v1 = vld [vmem:[#allocation5 + $0x180] ss:$24 sps:$4 sm:$0xff]   ;;  %v533_v4 = vld [vmem:[%s4615_s1 + $0x10] sm:$0xff]  ;;  %v3890_v5 = vld [vmem:[#allocation5 + $0x164] ss:$24 sps:$4 sm:$0xff]   ;;  %s3649_s3 = sshll.u32 %s4463_s14, 9 }
  0xa1   : > { %1199 = vmatpush1.bf16.msra.mxu1 %v3827_v23  ;;  %1157 = vmatprep.subr.bf16.mxu0 %v3828_v24  ;;  %v531_v3 = vld [vmem:[%s4615_s1] sm:$0xff]  ;;  %v3893_v8 = vld [vmem:[#allocation5 + $0x134] ss:$24 sps:$4 sm:$0xff]   ;;  %v3891_v9 = vld [vmem:[#allocation5 + $0x130] ss:$24 sps:$4 sm:$0xff]   ;;  %s529_s15 = scalar_lea.vmem [#allocation13], %s3426_s20 }
  0xa2   : > { %1200 = vmatprep.subr.bf16.mxu1 %v3830_v25  ;;  %v3888_v6 = vld [vmem:[#allocation5 + $0x160] ss:$24 sps:$4 sm:$0xff]   ;;  %v4637_v7 = vpack.c.bf16 %v533_v4, %v531_v3  ;;  %v3896_v10 = vld [vmem:[#allocation5 + $0x104] ss:$24 sps:$4 sm:$0xff]   ;;  %v3899_v12 = vld [vmem:[#allocation5 + $0xd4] ss:$24 sps:$4 sm:$0xff]  }
  0xa3   : > { %v3894_v11 = vld [vmem:[#allocation5 + $0x100] ss:$24 sps:$4 sm:$0xff]   ;;  %v3897_v13 = vld [vmem:[#allocation5 + $0xd0] ss:$24 sps:$4 sm:$0xff]   ;;  %v3902_v14 = vld [vmem:[#allocation5 + $0xa4] ss:$24 sps:$4 sm:$0xff]  }
  0xa4   : > { %1158 = vmatpush1.bf16.msra.mxu0 %v3832_v26  ;;  %v3900_v15 = vld [vmem:[#allocation5 + $0xa0] ss:$24 sps:$4 sm:$0xff]   ;;  %v3905_v16 = vld [vmem:[#allocation5 + $0x74] ss:$24 sps:$4 sm:$0xff]   ;;  %v3903_v17 = vld [vmem:[#allocation5 + $0x70] ss:$24 sps:$4 sm:$0xff]  }
  0xa5   : > { %1201 = vmatpush1.bf16.msra.mxu1 %v3833_v27  ;;  %1159 = vmatprep.subr.bf16.mxu0 %v3834_v28  ;;  %v3908_v18 = vld [vmem:[#allocation5 + $0x44] ss:$24 sps:$4 sm:$0xff]   ;;  %v3906_v19 = vld [vmem:[#allocation5 + $0x40] ss:$24 sps:$4 sm:$0xff]   ;;  %v3911_v20 = vld [vmem:[#allocation5 + $0x14] ss:$24 sps:$4 sm:$0xff]  }
  0xa6   : > { %1202 = vmatprep.subr.bf16.mxu1 %v3836_v29  ;;  %v3909_v21 = vld [vmem:[#allocation5 + $0x10] ss:$24 sps:$4 sm:$0xff]   ;;  %v3914_v22 = vld [vmem:[#allocation5 + $0x2e4] ss:$24 sps:$4 sm:$0xff]   ;;  %v3912_v23 = vld [vmem:[#allocation5 + $0x2e0] ss:$24 sps:$4 sm:$0xff]  }
  0xa7   : > { %v3917_v24 = vld [vmem:[#allocation5 + $0x2b4] ss:$24 sps:$4 sm:$0xff]   ;;  %v3915_v25 = vld [vmem:[#allocation5 + $0x2b0] ss:$24 sps:$4 sm:$0xff]   ;;  %v3920_v26 = vld [vmem:[#allocation5 + $0x284] ss:$24 sps:$4 sm:$0xff]  }
  0xa8   : > { %1160 = vmatpush1.bf16.msra.mxu0 %v3838_v30  ;;  %v3918_v27 = vld [vmem:[#allocation5 + $0x280] ss:$24 sps:$4 sm:$0xff]   ;;  %v3923_v28 = vld [vmem:[#allocation5 + $0x254] ss:$24 sps:$4 sm:$0xff]   ;;  %v3921_v29 = vld [vmem:[#allocation5 + $0x250] ss:$24 sps:$4 sm:$0xff]  }
  0xa9   : > { %1203 = vmatpush1.bf16.msra.mxu1 %v3839_v31  ;;  %1161 = vmatprep.subr.bf16.mxu0 %v3840_v32  ;;  %v3926_v30 = vld [vmem:[#allocation5 + $0x224] ss:$24 sps:$4 sm:$0xff]   ;;  %v3924_v31 = vld [vmem:[#allocation5 + $0x220] ss:$24 sps:$4 sm:$0xff]   ;;  %v3929_v32 = vld [vmem:[#allocation5 + $0x1f4] ss:$24 sps:$4 sm:$0xff]  }
  0xaa   : > { %1204 = vmatprep.subr.bf16.mxu1 %v3842_v33  ;;  %v3927_v33 = vld [vmem:[#allocation5 + $0x1f0] ss:$24 sps:$4 sm:$0xff]   ;;  %s3293_s29 = sshll.u32 %s529_s15, 4  ;;  %s4993_s17 = sld [smem:[#allocation25_spill]]  ;;  %s4901_s29 = int_to_ptr.vmem [resolvable:$true] %s3293_s29 }
  0xab   : > { %s3280_s14 = scalar_lea.sflag [#allocation4], %s4609_s7  ;;  %s4274_s20 = scalar_lea.vmem %s4901_s29, 512 }
  0xac   : > { %1162 = vmatpush2.bf16.msra.mxu0 %v3844_v34  ;;  %v3932_v34 = vld [vmem:[#allocation5 + $0x1c4] ss:$24 sps:$4 sm:$0xff]   ;;  %p4275_p10 = scmp.ne.s32.totalorder %s4901_s29, %s4274_s20  ;;  %p4994_p11 = scmp.ne.s32.totalorder %s4982_s13, 0 }
  0xad   : > { %1205 = vmatpush2.bf16.msra.mxu1 %v3845_v35  ;;  %1163 = vmatprep.subr.bf16.mxu0 %v3846_v36  ;;  %v3930_v35 = vld [vmem:[#allocation5 + $0x1c0] ss:$24 sps:$4 sm:$0xff]   ;;  %v3935_v36 = vld [vmem:[#allocation5 + $0x194] ss:$24 sps:$4 sm:$0xff]   ;;  %s4369_s22 = smov [#allocation13]  }
  0xae   : > { %1206 = vmatprep.subr.bf16.mxu1 %v3848_v37  ;;  %v3933_v37 = vld [vmem:[#allocation5 + $0x190] ss:$24 sps:$4 sm:$0xff]   ;;  %p4276_p0 = pnand %p4275_p10, %p4994_p11  ;;  %s4278_s5 = sshll.u32 %s4369_s22, 4  ;;  %s4279_s5 = int_to_ptr.vmem [resolvable:$false] %s4278_s5 }
  0xaf   : > { %s4280_s19 = scalar_lea.vmem %s4279_s5, 1024  ;;  %p4281_p5 = scmp.lt.s32.totalorder %s4901_s29, %s4279_s5 }
  0xb0   : > { %1164 = vmatpush2.bf16.msra.mxu0 %v3850_v38  ;;  %v4364_v38 = vmov 0.0   ;;  %s4899_s23 = scalar_lea.hbm %s4993_s17, %s3649_s3  ;;  %p4277_p13 = pneg %p4276_p0 }
  0xb1   : > { %1207 = vmatpush2.bf16.msra.mxu1 %v3851_v39  ;;  %1165 = vmatprep.subr.bf16.mxu0 %v3852_v40  ;;  %v635_v39 = vlaneseq  ;;  %p4282_p9 = scmp.lt.s32.totalorder %s4280_s19, %s4274_s20 }
  0xb2   : > { %1208 = vmatprep.subr.bf16.mxu1 %v3854_v41 }
  0xb3   : > { %v4648_v40 = vshrl.u32 %v635_v39, 7  ;;  %p4283_p1 = por %p4282_p9, %p4281_p5 }
  0xb4   : > { %1166 = vmatpush2.bf16.msra.mxu0 %v3856_v42 }
  0xb5   : > { %1209 = vmatpush2.bf16.msra.mxu1 %v3857_v43  ;;  %1167 = vmatprep.subr.bf16.mxu0 %v3858_v44  ;;  %v4651_v41 = vsub.s32 0, %v4648_v40  ;;  %v4654_v42 = vsub.s32 1, %v4648_v40  ;;  %v4656_v43 = vld [vmem:[#allocation7] sm:$0x3f]  ;;  %v645_v44 = vsub.s32 2, %v4648_v40  ;;  %v649_v46 = vsub.s32 3, %v4648_v40  ;;  %p4284_p3 = pnand %p4283_p1, %p4277_p13 }
  0xb6   : > { %1210 = vmatprep.subr.bf16.mxu1 %v3860_v45 }
  0xb7   : > { %v638_v45 = vrot.slane %v4656_v43, %v4651_v41 }
  0xb8   : > { %1168 = vmatpush2.bf16.msra.mxu0 %v3862_v47 }
  0xb9   : > { %1211 = vmatpush2.bf16.msra.mxu1 %v3863_v48  ;;  %1169 = vmatprep.subr.bf16.mxu0 %v3864_v50  ;;  %v4366_v48 = vmov 1983009808  }
  0xba   : > { %1212 = vmatprep.subr.bf16.mxu1 %v3866_v52  ;;  %v1292_v49 = vunpack.c.l.s4 %v4366_v48  ;;  %v646_v52 = vrot.slane %v4656_v43, %v645_v44 }
  0xbc   : > { %1170 = vmatpush2.bf16.msra.mxu0 %v3868_v53 }
  0xbd   : > { %1213 = vmatpush2.bf16.msra.mxu1 %v3869_v54  ;;  %1171 = vmatprep.subr.bf16.mxu0 %v3870_v55 }
  0xbe   : > { %1214 = vmatprep.subr.bf16.mxu1 %v3872_v56  ;;  %v650_v56 = vrot.slane %v4656_v43, %v649_v46 }
  0xc0   : > { %1172 = vmatpush2.bf16.msra.mxu0 %v3874_v57  ;;  %v1293_v57 = vunpack.c.0.s8 %v1292_v49 }
  0xc1   : > { %1215 = vmatpush2.bf16.msra.mxu1 %v3875_v58  ;;  %1173 = vmatprep.subr.bf16.mxu0 %v3876_v59 }
  0xc2   : > { %1216 = vmatprep.subr.bf16.mxu1 %v3878_v60 }
  0xc4   : > { %1174 = vmatpush2.bf16.msra.mxu0 %v3880_v61 }
  0xc5   : > { %1217 = vmatpush2.bf16.msra.mxu1 %v3881_v62  ;;  %1175 = vmatprep.subr.bf16.mxu0 %v3882_v63  ;;  %v4367_v63 = vmov 1934713408  }
  0xc6   : > { %1218 = vmatprep.subr.bf16.mxu1 %v3884_v0  ;;  %v1307_v0 = vunpack.c.l.s4 %v4367_v63 }
  0xc8   : > { %1176 = vmatpush2.bf16.msra.mxu0 %v3886_v1 }
  0xc9   : > { %1219 = vmatpush2.bf16.msra.mxu1 %v3887_v2  ;;  %1231 = vmatprep.subr.bf16.mxu0 %v3890_v5 }
  0xca   : > { %3670 = vmatprep.subr.bf16.mxu1 %v4364_v38 }
  0xcb   : > { %1178 = vmatmul.mubr.bf16.vlgmr.msra.gmra.mxu0 %v4637_v7 }
  0xcc   : > { %1221 = vmatmul.mubr.bf16.vlgmr.msra.gmra.mxu1 %v4637_v7  ;;  %1232 = vmatpush1.bf16.msra.mxu0 %v3888_v6 }
  0xcd   : > { %1263 = vmatprep.mubr.bf16.mxu0 %v536_v51  ;;  %1233 = vmatprep.subr.bf16.mxu0 %v3893_v8  ;;  %v642_v51 = vrot.slane %v4656_v43, %v4654_v42  ;;  %v4667_v8 = vsub.s32 %v1293_v57, %v4648_v40 }
  0xce   : > { %3672 = vmatprep.mubr.msk.bf16.mxu1 %vm4365_vm0, %v4364_v38 }
  0xd0   : > { %1234 = vmatpush1.bf16.msra.mxu0 %v3891_v9  ;;  %v4368_v9 = vmov 0  }
  0xd1   : > { %1235 = vmatprep.subr.bf16.mxu0 %v3896_v10  ;;  %v4671_v10 = vpack.i.b16 %v4368_v9, %v4368_v9 }
  0xd4   : > { %1236 = vmatpush1.bf16.msra.mxu0 %v3894_v11 }
  0xd5   : > { %1237 = vmatprep.subr.bf16.mxu0 %v3899_v12 }
  0xd8   : > { %1238 = vmatpush1.bf16.msra.mxu0 %v3897_v13 }
  0xd9   : > { %1239 = vmatprep.subr.bf16.mxu0 %v3902_v14 }
  0xdc   : > { %1240 = vmatpush1.bf16.msra.mxu0 %v3900_v15  ;;  %v1308_v15 = vunpack.c.0.s8 %v1307_v0 }
  0xdd   : > { %1241 = vmatprep.subr.bf16.mxu0 %v3905_v16 }
  0xe0   : > { %1242 = vmatpush1.bf16.msra.mxu0 %v3903_v17 }
  0xe1   : > { %1243 = vmatprep.subr.bf16.mxu0 %v3908_v18 }
  0xe4   : > { %1244 = vmatpush1.bf16.msra.mxu0 %v3906_v19 }
  0xe5   : > { %1245 = vmatprep.subr.bf16.mxu0 %v3911_v20 }
  0xe8   : > { %1246 = vmatpush1.bf16.msra.mxu0 %v3909_v21 }
  0xe9   : > { %1247 = vmatprep.subr.bf16.mxu0 %v3914_v22 }
  0xec   : > { %1248 = vmatpush2.bf16.msra.mxu0 %v3912_v23 }
  0xed   : > { %1249 = vmatprep.subr.bf16.mxu0 %v3917_v24 }
  0xf0   : > { %1250 = vmatpush2.bf16.msra.mxu0 %v3915_v25  ;;  %v4678_v25 = vsub.s32 %v1308_v15, %v4648_v40 }
  0xf1   : > { %1251 = vmatprep.subr.bf16.mxu0 %v3920_v26 }
  0xf4   : > { %1252 = vmatpush2.bf16.msra.mxu0 %v3918_v27 }
  0xf5   : > { %1253 = vmatprep.subr.bf16.mxu0 %v3923_v28 }
  0xf8   : > { %1254 = vmatpush2.bf16.msra.mxu0 %v3921_v29 }
  0xf9   : > { %1255 = vmatprep.subr.bf16.mxu0 %v3926_v30 }
  0xfc   : > { %1256 = vmatpush2.bf16.msra.mxu0 %v3924_v31 }
  0xfd   : > { %1257 = vmatprep.subr.bf16.mxu0 %v3929_v32 }
 0x100   : > { %1258 = vmatpush2.bf16.msra.mxu0 %v3927_v33 }
 0x101   : > { %1259 = vmatprep.subr.bf16.mxu0 %v3932_v34 }
 0x104   : > { %1260 = vmatpush2.bf16.msra.mxu0 %v3930_v35 }
 0x105   : > { %1261 = vmatprep.subr.bf16.mxu0 %v3935_v36 }
 0x108   : > { %1262 = vmatpush2.bf16.msra.mxu0 %v3933_v37 }
 0x109   : > { %3658 = vmatprep.subr.bf16.mxu0 %v4364_v38 }
 0x10b   : > { %1264 = vmatmul.mubr.bf16.vlgmr.msra.gmra.mxu0 %v4637_v7 }
 0x10c   : > { %3660 = vmatprep.mubr.msk.bf16.mxu0 %vm4365_vm0, %v4364_v38 }
 0x18b   : > { %v1179_v47 = vpop.f32.mrf.mxu0 }
 0x18c   : > { %v1222_v50 = vpop.f32.mrf.mxu1  ;;  %v1180_v55 = vadd.f32 %v1179_v47, %v638_v45 }
 0x18d   : > { %v1181_v53 = vpop.f32.mrf.mxu0  ;;  %v1223_v1 = vadd.f32 %v1222_v50, %v646_v52 }
 0x18e   : > { %v1224_v54 = vpop.f32.mrf.mxu1  ;;  %v1182_v60 = vadd.f32 %v1181_v53, %v642_v51 }
 0x18f   : > { %v1183_v58 = vpop.f32.mrf.mxu0  ;;  %v1225_v4 = vadd.f32 %v1224_v54, %v650_v56 }
 0x190   : > { %v1226_v59 = vpop.f32.mrf.mxu1  ;;  %v1184_v61 = vadd.f32 %v1183_v58, %v638_v45 }
 0x191   : > { %v1227_v62 = vadd.f32 %v1226_v59, %v646_v52  ;;  %v1185_v2 = vpop.f32.mrf.mxu0 }
 0x192   : > { %v1228_v3 = vpop.f32.mrf.mxu1  ;;  %v1274_v5 = vpack.c.bf16 %v1184_v61, %v1180_v55  ;;  %v1186_v6 = vadd.f32 %v1185_v2, %v642_v51 }
 0x193   : > { %v1229_v7 = vadd.f32 %v1228_v3, %v650_v56  ;;  %v1494_v12 = vpack.c.bf16 %v1227_v62, %v1223_v1 }
 0x194   : > { %v1280_v11 = vshrl.u32 %v1274_v5, 16  ;;  %v1275_v13 = vpack.c.bf16 %v1186_v6, %v1182_v60 }
 0x195   : > { %v1495_v14 = vpack.c.bf16 %v1229_v7, %v1225_v4  ;;  %v1500_v29 = vshrl.u32 %v1494_v12, 16 }
 0x196   : > { %v1278_v16 = vpack.i.b16 %v1275_v13, %v1274_v5  ;;  %v1281_v17 = vshrl.u32 %v1275_v13, 16 }
 0x197   : > { %v1498_v18 = vpack.i.b16 %v1495_v14, %v1494_v12  ;;  %v1501_v22 = vshrl.u32 %v1495_v14, 16 }
 0x198   : > { %v1282_v19 = vpack.i.b16 %v1281_v17, %v1280_v11  ;;  %v1290_v20 = vcombine.high %v1278_v16, %v4671_v10  ;;  %v1297_v21 = vrot.slane %v1278_v16, %v4667_v8 }
 0x199   : > { %v1504_v23 = vcombine.high %v1498_v18, %v4671_v10  ;;  %v1511_v24 = vrot.slane %v1498_v18, %v4667_v8  ;;  %v1502_v35 = vpack.i.b16 %v1501_v22, %v1500_v29 }
 0x19a   : > { %v1304_v26 = vrot.slane %v1290_v20, %v4667_v8  ;;  %v1305_v27 = vcombine.high %v1297_v21, %v4368_v9  ;;  %v1339_v28 = vcombine.high %v1282_v19, %v4671_v10  ;;  %v1346_v30 = vrot.slane %v1282_v19, %v4667_v8 }
 0x19b   : > { %v1518_v31 = vrot.slane %v1504_v23, %v4667_v8  ;;  %v1519_v34 = vcombine.high %v1511_v24, %v4368_v9  ;;  %v1312_v37 = vrot.slane %v1297_v21, %v4678_v25  ;;  %v1553_v52 = vcombine.high %v1502_v35, %v4671_v10 }
 0x19c   : > { %v1320_v32 = vcombine.high %v1304_v26, %v4368_v9  ;;  %v1353_v33 = vrot.slane %v1339_v28, %v4667_v8  ;;  %v1319_v39 = vrot.slane %v1305_v27, %v4678_v25  ;;  %v1327_v45 = vrot.slane %v1304_v26, %v4678_v25 }
 0x19d   : > { %v1534_v36 = vcombine.high %v1518_v31, %v4368_v9  ;;  %v1354_v47 = vcombine.high %v1346_v30, %v4368_v9  ;;  %v1533_v48 = vrot.slane %v1519_v34, %v4678_v25  ;;  %v1361_v53 = vrot.slane %v1346_v30, %v4678_v25 }
 0x19e   : > { %v1369_v44 = vcombine.high %v1353_v33, %v4368_v9  ;;  %v1334_v46 = vrot.slane %v1320_v32, %v4678_v25  ;;  %v1376_v50 = vrot.slane %v1353_v33, %v4678_v25  ;;  %v1388_v54 = vcombine.low %v1312_v37, %v1319_v39 }
 0x19f   : > { %v1548_v49 = vrot.slane %v1534_v36, %v4678_v25  ;;  %v1526_v55 = vrot.slane %v1511_v24, %v4678_v25  ;;  %v1541_v56 = vrot.slane %v1518_v31, %v4678_v25  ;;  %v1368_v57 = vrot.slane %v1354_v47, %v4678_v25 }
 0x1a0   : > { %v1383_v51 = vrot.slane %v1369_v44, %v4678_v25  ;;  %v1404_v58 = vcombine.low %v1327_v45, %v1334_v46  ;;  %v1560_v59 = vrot.slane %v1502_v35, %v4667_v8  ;;  %v1567_v60 = vrot.slane %v1553_v52, %v4667_v8 }
 0x1a1   : > { %v1602_v61 = vcombine.low %v1526_v55, %v1533_v48  ;;  %v3533_v62 = vcombine.high %v1526_v55, %v1533_v48  ;;  %v1618_v63 = vcombine.low %v1541_v56, %v1548_v49  ;;  %v3534_v0 = vcombine.high %v1541_v56, %v1548_v49 }
 0x1a2   : > { %v1453_v1 = vcombine.low %v1376_v50, %v1383_v51  ;;  %v3532_v2 = vcombine.high %v1376_v50, %v1383_v51  ;;  %v1568_v3 = vcombine.high %v1560_v59, %v4368_v9  ;;  %v1583_v4 = vcombine.high %v1567_v60, %v4368_v9 }
 0x1a3   : > { %v1609_v5 = vrot.slane %v1602_v61, %v4667_v8  ;;  %v1617_v6 = vrot.slane %v3533_v62, %v4667_v8  ;;  %v1625_v7 = vrot.slane %v1618_v63, %v4667_v8  ;;  %v1633_v11 = vrot.slane %v3534_v0, %v4667_v8 }
 0x1a4   : > { %v1575_v12 = vrot.slane %v1560_v59, %v4678_v25  ;;  %v1582_v13 = vrot.slane %v1568_v3, %v4678_v25  ;;  %v1590_v14 = vrot.slane %v1567_v60, %v4678_v25  ;;  %v1597_v15 = vrot.slane %v1583_v4, %v4678_v25 }
 0x1a5   : > { %v3530_v16 = vcombine.high %v1327_v45, %v1334_v46  ;;  %v1437_v17 = vcombine.low %v1361_v53, %v1368_v57  ;;  %v3531_v18 = vcombine.high %v1361_v53, %v1368_v57  ;;  %v1642_v19 = vcombine.low %v1625_v7, %v1633_v11 }
 0x1a6   : > { %v1651_v20 = vcombine.low %v1575_v12, %v1582_v13  ;;  %v3535_v21 = vcombine.high %v1575_v12, %v1582_v13  ;;  %v1667_v22 = vcombine.low %v1590_v14, %v1597_v15  ;;  %v3536_v23 = vcombine.high %v1590_v14, %v1597_v15 }
 0x1a7   : > { %v3529_v24 = vcombine.high %v1312_v37, %v1319_v39  ;;  %v1634_v26 = vcombine.low %v1609_v5, %v1617_v6  ;;  %v1460_v27 = vrot.slane %v1453_v1, %v4667_v8  ;;  %v1468_v28 = vrot.slane %v3532_v2, %v4667_v8 }
 0x1a8   : > { %v1658_v29 = vrot.slane %v1651_v20, %v4667_v8  ;;  %v1666_v30 = vrot.slane %v3535_v21, %v4667_v8  ;;  %v1674_v31 = vrot.slane %v1667_v22, %v4667_v8  ;;  %v1682_v32 = vrot.slane %v3536_v23, %v4667_v8 }
 0x1a9   : > { %v1411_v33 = vrot.slane %v1404_v58, %v4667_v8  ;;  %v1419_v34 = vrot.slane %v3530_v16, %v4667_v8  ;;  %v1444_v35 = vrot.slane %v1437_v17, %v4667_v8  ;;  %v1452_v36 = vrot.slane %v3531_v18, %v4667_v8 }
 0x1aa   : > { %v1649_v37 = vrot.slane %v1642_v19, %v4678_v25  ;;  %v1683_v39 = vcombine.low %v1658_v29, %v1666_v30  ;;  %v1691_v44 = vcombine.low %v1674_v31, %v1682_v32  ;;  %v1395_v45 = vrot.slane %v1388_v54, %v4667_v8 }
 0x1ab   : > { %v1403_v46 = vrot.slane %v3529_v24, %v4667_v8  ;;  %v1477_v47 = vcombine.low %v1460_v27, %v1468_v28  ;;  %v1641_v48 = vrot.slane %v1634_v26, %v4678_v25  ;;  %v1428_v51 = vcombine.low %v1411_v33, %v1419_v34 }
 0x1ac   : > { %v1690_v49 = vrot.slane %v1683_v39, %v4678_v25  ;;  %v1698_v50 = vrot.slane %v1691_v44, %v4678_v25  ;;  %v1469_v52 = vcombine.low %v1444_v35, %v1452_v36  ;;  %v653_v6 = vsub.s32 4, %v4648_v40 }
 0x1ad   : > { %v1650_v53 = vcombine.low %v1641_v48, %v1649_v37  ;;  %v1420_v56 = vcombine.low %v1395_v45, %v1403_v46  ;;  %v1484_v57 = vrot.slane %v1477_v47, %v4678_v25  ;;  %v1435_v59 = vrot.slane %v1428_v51, %v4678_v25 }
 0x1ae   : > { %v1699_v55 = vcombine.low %v1690_v49, %v1698_v50  ;;  %v1476_v54 = vrot.slane %v1469_v52, %v4678_v25  ;;  %v657_v7 = vsub.s32 5, %v4648_v40  ;;  %v654_v11 = vrot.slane %v4656_v43, %v653_v6 }
 0x1af   : > { %v1427_v60 = vrot.slane %v1420_v56, %v4678_v25  ;;  %v1704_v0 = vshrl.u32 %v1650_v53, 16 }
 0x1b0   : > { %v1702_v58 = vpack.i.b16 %v1699_v55, %v1650_v53  ;;  %v1485_v61 = vcombine.low %v1476_v54, %v1484_v57  ;;  %v1705_v62 = vshrl.u32 %v1699_v55, 16  ;;  %v658_v13 = vrot.slane %v4656_v43, %v657_v7 }
 0x1b1   : > { %v1436_v63 = vcombine.low %v1427_v60, %v1435_v59 }
 0x1b2   : > { %3659 = vmatpush3.bf16.xpose.msra.mxu0 %v1702_v58  ;;  %v1706_v2 = vpack.i.b16 %v1705_v62, %v1704_v0  ;;  %v1491_v3 = vshrl.u32 %v1485_v61, 16 }
 0x1b3   : > { %3664 = vmatprep.subr.bf16.mxu0 %v4364_v38  ;;  %v1488_v1 = vpack.i.b16 %v1485_v61, %v1436_v63  ;;  %v1490_v4 = vshrl.u32 %v1436_v63, 16 }
 0x1b5   : > { %v1492_v5 = vpack.i.b16 %v1491_v3, %v1490_v4 }
 0x1b9   : > { %3661 = vmatmul.mubr.bf16.vlgmr.msra.gmra.mxu0 %v1488_v1 }
 0x1ba   : > { %3665 = vmatpush3.bf16.xpose.msra.mxu0 %v1706_v2  ;;  %3666 = vmatprep.mubr.msk.bf16.mxu0 %vm4365_vm0, %v4364_v38 }
 0x1c1   : > { %3667 = vmatmul.mubr.bf16.vlgmr.msra.gmra.mxu0 %v1492_v5 }
 0x1cb   : > { %v1265_v12 = vpop.f32.mrf.mxu0 }
 0x1cc   : > { %v1266_v15 = vadd.f32 %v1265_v12, %v654_v11 }
 0x1cd   : > { %v1267_v14 = vpop.f32.mrf.mxu0 }
 0x1ce   : > { %v1268_v17 = vadd.f32 %v1267_v14, %v658_v13 }
 0x1cf   : > { %v1269_v16 = vpop.f32.mrf.mxu0 }
 0x1d0   : > { %v1270_v18 = vadd.f32 %v1269_v16, %v654_v11 }
 0x1d1   : > { %v1271_v19 = vpop.f32.mrf.mxu0 }
 0x1d2   : > { %v1708_v20 = vpack.c.bf16 %v1270_v18, %v1266_v15  ;;  %v1272_v21 = vadd.f32 %v1271_v19, %v658_v13 }
 0x1d4   : > { %v1714_v22 = vshrl.u32 %v1708_v20, 16  ;;  %v1709_v23 = vpack.c.bf16 %v1272_v21, %v1268_v17 }
 0x1d6   : > { %v1712_v24 = vpack.i.b16 %v1709_v23, %v1708_v20  ;;  %v1715_v26 = vshrl.u32 %v1709_v23, 16 }
 0x1d8   : > { %v1716_v27 = vpack.i.b16 %v1715_v26, %v1714_v22  ;;  %v1718_v40 = vcombine.high %v1712_v24, %v4671_v10  ;;  %v1725_v28 = vrot.slane %v1712_v24, %v4667_v8 }
 0x1da   : > { %v1732_v29 = vrot.slane %v1718_v40, %v4667_v8  ;;  %v1733_v43 = vcombine.high %v1725_v28, %v4368_v9  ;;  %v1740_v30 = vrot.slane %v1725_v28, %v4678_v25  ;;  %v1767_v31 = vcombine.high %v1716_v27, %v4671_v10 }
 0x1db   : > { %v1774_v32 = vrot.slane %v1716_v27, %v4667_v8 }
 0x1dc   : > { %v1747_v33 = vrot.slane %v1733_v43, %v4678_v25  ;;  %v1748_v34 = vcombine.high %v1732_v29, %v4368_v9  ;;  %v1755_v35 = vrot.slane %v1732_v29, %v4678_v25  ;;  %v1781_v36 = vrot.slane %v1767_v31, %v4667_v8 }
 0x1dd   : > { %v1782_v37 = vcombine.high %v1774_v32, %v4368_v9  ;;  %v1789_v39 = vrot.slane %v1774_v32, %v4678_v25 }
 0x1de   : > { %v1762_v44 = vrot.slane %v1748_v34, %v4678_v25  ;;  %v1797_v45 = vcombine.high %v1781_v36, %v4368_v9  ;;  %v1804_v10 = vrot.slane %v1781_v36, %v4678_v25  ;;  %v1816_v46 = vcombine.low %v1740_v30, %v1747_v33 }
 0x1df   : > { %v1796_v47 = vrot.slane %v1782_v37, %v4678_v25  ;;  %v3537_v48 = vcombine.high %v1740_v30, %v1747_v33 }
 0x1e0   : > { %v1811_v49 = vrot.slane %v1797_v45, %v4678_v25  ;;  %v1832_v50 = vcombine.low %v1755_v35, %v1762_v44  ;;  %v3538_v51 = vcombine.high %v1755_v35, %v1762_v44  ;;  %v1823_v52 = vrot.slane %v1816_v46, %v4667_v8 }
 0x1e1   : > { %v1831_v53 = vrot.slane %v3537_v48, %v4667_v8  ;;  %v1865_v55 = vcombine.low %v1789_v39, %v1796_v47  ;;  %v3539_v56 = vcombine.high %v1789_v39, %v1796_v47 }
 0x1e2   : > { %v1839_v57 = vrot.slane %v1832_v50, %v4667_v8  ;;  %v1847_v9 = vrot.slane %v3538_v51, %v4667_v8  ;;  %v1881_v58 = vcombine.low %v1804_v10, %v1811_v49  ;;  %v3540_v59 = vcombine.high %v1804_v10, %v1811_v49 }
 0x1e3   : > { %v1872_v54 = vrot.slane %v1865_v55, %v4667_v8  ;;  %v1880_v60 = vrot.slane %v3539_v56, %v4667_v8  ;;  %v1848_v63 = vcombine.low %v1823_v52, %v1831_v53 }
 0x1e4   : > { %v1888_v61 = vrot.slane %v1881_v58, %v4667_v8  ;;  %v1896_v62 = vrot.slane %v3540_v59, %v4667_v8  ;;  %v1856_v0 = vcombine.low %v1839_v57, %v1847_v9 }
 0x1e5   : > { %v1897_v1 = vcombine.low %v1872_v54, %v1880_v60  ;;  %v1855_v3 = vrot.slane %v1848_v63, %v4678_v25  ;;  %v3938_v54 = vld [vmem:[#allocation8 + $0x74] ss:$8 sps:$4 sm:$0xff]  }
 0x1e6   : > { %v1905_v2 = vcombine.low %v1888_v61, %v1896_v62  ;;  %v1863_v4 = vrot.slane %v1856_v0, %v4678_v25  ;;  %v3936_v0 = vld [vmem:[#allocation8 + $0x70] ss:$8 sps:$4 sm:$0xff]  }
 0x1e7   : > { %v1904_v5 = vrot.slane %v1897_v1, %v4678_v25 }
 0x1e8   : > { %v1912_v6 = vrot.slane %v1905_v2, %v4678_v25  ;;  %v1864_v7 = vcombine.low %v1855_v3, %v1863_v4  ;;  %v3941_v2 = vld [vmem:[#allocation8 + $0x64] ss:$8 sps:$4 sm:$0xff]   ;;  %v3939_v3 = vld [vmem:[#allocation8 + $0x60] ss:$8 sps:$4 sm:$0xff]   ;;  %v3944_v4 = vld [vmem:[#allocation8 + $0x54] ss:$8 sps:$4 sm:$0xff]  }
 0x1ea   : > { %v1913_v11 = vcombine.low %v1904_v5, %v1912_v6  ;;  %v1918_v13 = vshrl.u32 %v1864_v7, 16  ;;  %v3942_v5 = vld [vmem:[#allocation8 + $0x50] ss:$8 sps:$4 sm:$0xff]   ;;  %v3947_v6 = vld [vmem:[#allocation8 + $0x44] ss:$8 sps:$4 sm:$0xff]  }
 0x1ec   : > { %v1916_v12 = vpack.i.b16 %v1913_v11, %v1864_v7  ;;  %v1919_v14 = vshrl.u32 %v1913_v11, 16  ;;  %v3945_v7 = vld [vmem:[#allocation8 + $0x40] ss:$8 sps:$4 sm:$0xff]   ;;  %v3950_v11 = vld [vmem:[#allocation8 + $0x34] ss:$8 sps:$4 sm:$0xff]  }
 0x1ee   : > { %3671 = vmatpush3.bf16.msra.mxu1 %v1916_v12  ;;  %v1920_v15 = vpack.i.b16 %v1919_v14, %v1918_v13  ;;  %v3948_v12 = vld [vmem:[#allocation8 + $0x30] ss:$8 sps:$4 sm:$0xff]   ;;  %v3953_v13 = vld [vmem:[#allocation8 + $0x24] ss:$8 sps:$4 sm:$0xff]   ;;  %v3951_v14 = vld [vmem:[#allocation8 + $0x20] ss:$8 sps:$4 sm:$0xff]  }
 0x1ef   : > { %3676 = vmatprep.subr.bf16.mxu1 %v4364_v38 }
 0x279   : > { %v1956_v16 = vpop.f32.mrf.mxu0 }
 0x27a   : > { %v2005_v17 = vsel %vm2004_vm1, %v1956_v16, -inf }
 0x27b   : > { %2006 = vmax.xlane.f32.xlu0 %v2005_v17  ;;  %v3662_v18 = vpop.f32.mrf.mxu0  ;;  %v3959_v17 = vld [vmem:[#allocation8 + $0x4] ss:$8 sps:$4 sm:$0xff]  }
 0x27c   : > { %v3957_v18 = vld [vmem:[#allocation8] ss:$8 sps:$4 sm:$0xff]  }
 0x27d   : > { %v1959_v19 = vpop.f32.mrf.mxu0 }
 0x27e   : > { %v2008_v20 = vsel %vm2004_vm1, %v1959_v19, -inf }
 0x27f   : > { %2009 = vmax.xlane.f32.xlu0 %v2008_v20  ;;  %v3663_v21 = vpop.f32.mrf.mxu0  ;;  %v3960_v20 = vld [vmem:[#allocation8 + $0xf0] ss:$8 sps:$4 sm:$0xff]  }
 0x280   : > { %v3965_v21 = vld [vmem:[#allocation8 + $0xe4] ss:$8 sps:$4 sm:$0xff]  }
 0x281   : > { %v1997_v22 = vpop.f32.mrf.mxu0 }
 0x282   : > { %v2011_v23 = vsel %vm2004_vm1, %v1997_v22, -inf }
 0x283   : > { %2012 = vmax.xlane.f32.xlu1 %v2011_v23  ;;  %v3668_v24 = vpop.f32.mrf.mxu0  ;;  %v3968_v23 = vld [vmem:[#allocation8 + $0xd4] ss:$8 sps:$4 sm:$0xff]  }
 0x284   : > { %v3966_v24 = vld [vmem:[#allocation8 + $0xd0] ss:$8 sps:$4 sm:$0xff]  }
 0x285   : > { %v2000_v26 = vpop.f32.mrf.mxu0 }
 0x286   : > { %v2014_v27 = vsel %vm2004_vm1, %v2000_v26, -inf }
 0x287   : > { %2015 = vmax.xlane.f32.xlu1 %v2014_v27  ;;  %v3669_v40 = vpop.f32.mrf.mxu0  ;;  %v3969_v27 = vld [vmem:[#allocation8 + $0xc0] ss:$8 sps:$4 sm:$0xff]  }
 0x288   : > { %v3974_v40 = vld [vmem:[#allocation8 + $0xb4] ss:$8 sps:$4 sm:$0xff]  }
 0x304   : > { %v2007_v28 = vpop.xlane.xlu0 %2006 }
 0x305   : > { %v2017_v29 = vsub.f32 %v1956_v16, %v2007_v28  ;;  %v3954_v16 = vld [vmem:[#allocation8 + $0x10] ss:$8 sps:$4 sm:$0xff]  }
 0x306   : > { %v3972_v28 = vld [vmem:[#allocation8 + $0xb0] ss:$8 sps:$4 sm:$0xff]  }
 0x307   : > { %v2021_v43 = vmul.f32 1.442695, %v2017_v29  ;;  %v3977_v29 = vld [vmem:[#allocation8 + $0xa4] ss:$8 sps:$4 sm:$0xff]  }
 0x308   : > { %v2010_v30 = vpop.xlane.xlu0 %2009 }
 0x309   : > { %4080 = vpow2.f32 %v2021_v43  ;;  %v2018_v31 = vsub.f32 %v1959_v19, %v2010_v30  ;;  %v3962_v19 = vld [vmem:[#allocation8 + $0xf4] ss:$8 sps:$4 sm:$0xff]   ;;  %v3975_v43 = vld [vmem:[#allocation8 + $0xa0] ss:$8 sps:$4 sm:$0xff]  }
 0x30a   : > { %v3980_v30 = vld [vmem:[#allocation8 + $0x94] ss:$8 sps:$4 sm:$0xff]  }
 0x30b   : > { %v2023_v32 = vmul.f32 1.442695, %v2018_v31  ;;  %v3978_v31 = vld [vmem:[#allocation8 + $0x90] ss:$8 sps:$4 sm:$0xff]  }
 0x30c   : > { %v2013_v33 = vpop.xlane.xlu1 %2012 }
 0x30d   : > { %4082 = vpow2.f32 %v2023_v32  ;;  %v2019_v34 = vsub.f32 %v1997_v22, %v2013_v33  ;;  %v3963_v22 = vld [vmem:[#allocation8 + $0xe0] ss:$8 sps:$4 sm:$0xff]   ;;  %v3983_v32 = vld [vmem:[#allocation8 + $0x84] ss:$8 sps:$4 sm:$0xff]  }
 0x30e   : > { %v3981_v33 = vld [vmem:[#allocation8 + $0x80] ss:$8 sps:$4 sm:$0xff]  }
 0x30f   : > { %v2025_v35 = vmul.f32 1.442695, %v2019_v34 }
 0x310   : > { %v2016_v36 = vpop.xlane.xlu1 %2015 }
 0x311   : > { %4084 = vpow2.f32 %v2025_v35  ;;  %v2020_v37 = vsub.f32 %v2000_v26, %v2016_v36  ;;  %v3971_v26 = vld [vmem:[#allocation8 + $0xc4] ss:$8 sps:$4 sm:$0xff]  }
 0x313   : > { %v2027_v39 = vmul.f32 1.442695, %v2020_v37 }
 0x315   : > { %4086 = vpow2.f32 %v2027_v39 }
 0x316   : > { %v4081_v44 = vpop.eup %4080 }
 0x317   : > { %v2029_v45 = vsel %vm2004_vm1, %v4081_v44, 0.0 }
 0x318   : > { %2030 = vadd.xlane.f32.xlu0 %v2029_v45 }
 0x31a   : > { %v4083_v10 = vpop.eup %4082 }
 0x31b   : > { %v2032_v46 = vsel %vm2004_vm1, %v4083_v10, 0.0 }
 0x31c   : > { %2033 = vadd.xlane.f32.xlu1 %v2032_v46 }
 0x31e   : > { %v4085_v47 = vpop.eup %4084 }
 0x31f   : > { %v2035_v48 = vsel %vm2004_vm1, %v4085_v47, 0.0 }
 0x320   : > { %2036 = vadd.xlane.f32.xlu0 %v2035_v48 }
 0x322   : > { %v4087_v49 = vpop.eup %4086 }
 0x323   : > { %v2038_v50 = vsel %vm2004_vm1, %v4087_v49, 0.0 }
 0x324   : > { %2039 = vadd.xlane.f32.xlu1 %v2038_v50 }
 0x3a1   : > { %v2031_v51 = vpop.xlane.xlu0 %2030 }
 0x3a2   : > { %4088 = vrcp.f32 %v2031_v51 }
 0x3a5   : > { %v2034_v52 = vpop.xlane.xlu1 %2033 }
 0x3a6   : > { %4090 = vrcp.f32 %v2034_v52 }
 0x3a9   : > { %v2037_v53 = vpop.xlane.xlu0 %2036 }
 0x3aa   : > { %4092 = vrcp.f32 %v2037_v53 }
 0x3ad   : > { %v2040_v55 = vpop.xlane.xlu1 %2039 }
 0x3ae   : > { %4094 = vrcp.f32 %v2040_v55 }
 0x3af   : > { %v4089_v56 = vpop.eup %4088 }
 0x3b0   : > { %v2045_v9 = vmul.f32 %v4089_v56, %v4081_v44 }
 0x3b3   : > { %v4091_v57 = vpop.eup %4090 }
 0x3b4   : > { %v2046_v58 = vmul.f32 %v4091_v57, %v4083_v10 }
 0x3b6   : > { %v2049_v59 = vpack.c.bf16 %v2046_v58, %v2045_v9 }
 0x3b7   : > { %v4093_v60 = vpop.eup %4092 }
 0x3b8   : > { %3673 = vmatmul.mubr.msk.bf16.vlgmr.msra.gmra.mxu1 %vm2004_vm1, %v2049_v59  ;;  %v2047_v62 = vmul.f32 %v4093_v60, %v4085_v47 }
 0x3b9   : > { %3677 = vmatpush3.bf16.msra.mxu1 %v1920_v15  ;;  %3678 = vmatprep.mubr.msk.bf16.mxu1 %vm4365_vm0, %v4364_v38  ;;  %v3956_v15 = vld [vmem:[#allocation8 + $0x14] ss:$8 sps:$4 sm:$0xff]  }
 0x3ba   : > { %2577 = vmatprep.subr.bf16.mxu1 %v3938_v54 }
 0x3bb   : > { %v4095_v61 = vpop.eup %4094 }
 0x3bc   : > { %v2048_v63 = vmul.f32 %v4095_v61, %v4087_v49 }
 0x3be   : > { %v2050_v1 = vpack.c.bf16 %v2048_v63, %v2047_v62 }
 0x3c0   : > { %3679 = vmatmul.mubr.msk.bf16.vlgmr.msra.gmra.mxu1 %vm2004_vm1, %v2050_v1 }
 0x3c1   : > { %2578 = vmatpush1.bf16.msra.mxu1 %v3936_v0 }
 0x3c2   : > { %2579 = vmatprep.subr.bf16.mxu1 %v3941_v2 }
 0x3c5   : > { %2580 = vmatpush1.bf16.msra.mxu1 %v3939_v3 }
 0x3c6   : > { %2581 = vmatprep.subr.bf16.mxu1 %v3944_v4 }
 0x3c9   : > { %2582 = vmatpush1.bf16.msra.mxu1 %v3942_v5 }
 0x3ca   : > { %2583 = vmatprep.subr.bf16.mxu1 %v3947_v6 }
 0x3cd   : > { %2584 = vmatpush1.bf16.msra.mxu1 %v3945_v7 }
 0x3ce   : > { %2585 = vmatprep.subr.bf16.mxu1 %v3950_v11 }
 0x3d1   : > { %2586 = vmatpush1.bf16.msra.mxu1 %v3948_v12 }
 0x3d2   : > { %2587 = vmatprep.subr.bf16.mxu1 %v3953_v13 }
 0x3d5   : > { %2588 = vmatpush1.bf16.msra.mxu1 %v3951_v14 }
 0x3d6   : > { %2589 = vmatprep.subr.bf16.mxu1 %v3956_v15 }
 0x3d9   : > { %2590 = vmatpush1.bf16.msra.mxu1 %v3954_v16 }
 0x3da   : > { %2591 = vmatprep.subr.bf16.mxu1 %v3959_v17 }
 0x3dd   : > { %2592 = vmatpush1.bf16.msra.mxu1 %v3957_v18 }
 0x3de   : > { %2593 = vmatprep.subr.bf16.mxu1 %v3962_v19 }
 0x3e1   : > { %2594 = vmatpush2.bf16.msra.mxu1 %v3960_v20 }
 0x3e2   : > { %2595 = vmatprep.subr.bf16.mxu1 %v3965_v21 }
 0x3e5   : > { %2596 = vmatpush2.bf16.msra.mxu1 %v3963_v22 }
 0x3e6   : > { %2597 = vmatprep.subr.bf16.mxu1 %v3968_v23 }
 0x3e9   : > { %2598 = vmatpush2.bf16.msra.mxu1 %v3966_v24 }
 0x3ea   : > { %2599 = vmatprep.subr.bf16.mxu1 %v3971_v26 }
 0x3ed   : > { %2600 = vmatpush2.bf16.msra.mxu1 %v3969_v27 }
 0x3ee   : > { %2601 = vmatprep.subr.bf16.mxu1 %v3974_v40 }
 0x3f1   : > { %2602 = vmatpush2.bf16.msra.mxu1 %v3972_v28 }
 0x3f2   : > { %2603 = vmatprep.subr.bf16.mxu1 %v3977_v29 }
 0x3f5   : > { %2604 = vmatpush2.bf16.msra.mxu1 %v3975_v43 }
 0x3f6   : > { %2605 = vmatprep.subr.bf16.mxu1 %v3980_v30 }
 0x3f9   : > { %2606 = vmatpush2.bf16.msra.mxu1 %v3978_v31 }
 0x3fa   : > { %2607 = vmatprep.subr.bf16.mxu1 %v3983_v32 }
 0x3fd   : > { %2608 = vmatpush2.bf16.msra.mxu1 %v3981_v33 }
 0x478   : > { %v2088_v34 = vpop.f32.mrf.mxu1 }
 0x479   : > { %v2139_v39 = vcombine.high %v2088_v34, %v4364_v38  ;;  %v2146_v45 = vrot.slane %v2088_v34, %v4667_v8 }
 0x47a   : > { %v3674_v35 = vpop.f32.mrf.mxu1 }
 0x47b   : > { %v2153_v48 = vrot.slane %v2139_v39, %v4667_v8 }
 0x47c   : > { %v2091_v36 = vpop.f32.mrf.mxu1 }
 0x47d   : > { %v2205_v52 = vcombine.high %v2091_v36, %v4364_v38  ;;  %v2212_v58 = vrot.slane %v2091_v36, %v4667_v8 }
 0x47e   : > { %v3675_v37 = vpop.f32.mrf.mxu1 }
 0x47f   : > { %v2219_v1 = vrot.slane %v2205_v52, %v4667_v8  ;;  %v4113_v52 = vld [vmem:[%s4615_s1 + $0x8] sm:$0xff] }
 0x480   : > { %v2132_v44 = vpop.f32.mrf.mxu1 }
 0x481   : > { %v2154_v10 = vcombine.high %v2132_v44, %v4364_v38  ;;  %v2161_v46 = vrot.slane %v2132_v44, %v4667_v8 }
 0x482   : > { %v3680_v47 = vpop.f32.mrf.mxu1 }
 0x483   : > { %v2168_v49 = vrot.slane %v2154_v10, %v4667_v8  ;;  %v2169_v50 = vcombine.low %v2146_v45, %v2161_v46  ;;  %v2170_v51 = vcombine.high %v2146_v45, %v2161_v46 }
 0x484   : > { %v2135_v53 = vpop.f32.mrf.mxu1 }
 0x485   : > { %v2177_v55 = vrot.slane %v2169_v50, %v4678_v25  ;;  %v2184_v56 = vrot.slane %v2170_v51, %v4678_v25  ;;  %v2185_v57 = vcombine.low %v2153_v48, %v2168_v49  ;;  %v2186_v9 = vcombine.high %v2153_v48, %v2168_v49  ;;  %v4112_v50 = vld [vmem:[%s4615_s1] sm:$0xff] }
 0x486   : > { %v2220_v59 = vcombine.high %v2135_v53, %v4364_v38  ;;  %v2227_v54 = vrot.slane %v2135_v53, %v4667_v8  ;;  %v3681_v60 = vpop.f32.mrf.mxu1 }
 0x487   : > { %v2193_v61 = vrot.slane %v2185_v57, %v4678_v25  ;;  %v2200_v62 = vrot.slane %v2186_v9, %v4678_v25  ;;  %v2271_v63 = vcombine.low %v2177_v55, %v2184_v56  ;;  %v3543_v0 = vcombine.high %v2177_v55, %v2184_v56 }
 0x488   : > { %v2234_v2 = vrot.slane %v2220_v59, %v4667_v8  ;;  %v2235_v3 = vcombine.low %v2212_v58, %v2227_v54  ;;  %v2236_v4 = vcombine.high %v2212_v58, %v2227_v54  ;;  %v4114_v58 = vld [vmem:[%s4615_s1 + $0x10] sm:$0xff]  ;;  %v4115_v54 = vld [vmem:[%s4615_s1 + $0x18] sm:$0xff] }
 0x489   : > { %v2287_v5 = vcombine.low %v2193_v61, %v2200_v62  ;;  %v3544_v6 = vcombine.high %v2193_v61, %v2200_v62  ;;  %v2278_v13 = vrot.slane %v2271_v63, %v4667_v8  ;;  %v2286_v14 = vrot.slane %v3543_v0, %v4667_v8  ;;  %v3984_v62 = vld [vmem:[#allocation10 + $0x70] ss:$8 sps:$4 sm:$0xff]   ;;  %v3986_v63 = vld [vmem:[#allocation10 + $0x74] ss:$8 sps:$4 sm:$0xff]   ;;  %v3989_v0 = vld [vmem:[#allocation10 + $0x64] ss:$8 sps:$4 sm:$0xff]  }
 0x48a   : > { %v2243_v7 = vrot.slane %v2235_v3, %v4678_v25  ;;  %v2250_v38 = vrot.slane %v2236_v4, %v4678_v25  ;;  %v2251_v11 = vcombine.low %v2219_v1, %v2234_v2  ;;  %v2252_v12 = vcombine.high %v2219_v1, %v2234_v2  ;;  %2895 = vmatprep.subr.bf16.mxu0 %v3986_v63  ;;  %v3987_v1 = vld [vmem:[#allocation10 + $0x60] ss:$8 sps:$4 sm:$0xff]   ;;  %v3992_v2 = vld [vmem:[#allocation10 + $0x54] ss:$8 sps:$4 sm:$0xff]   ;;  %v3990_v3 = vld [vmem:[#allocation10 + $0x50] ss:$8 sps:$4 sm:$0xff]  }
 0x48b   : > { %v2294_v15 = vrot.slane %v2287_v5, %v4667_v8  ;;  %v2302_v16 = vrot.slane %v3544_v6, %v4667_v8  ;;  %v2303_v28 = vcombine.low %v2278_v13, %v2286_v14  ;;  %2896 = vmatpush1.bf16.msra.mxu0 %v3984_v62  ;;  %v3995_v4 = vld [vmem:[#allocation10 + $0x44] ss:$8 sps:$4 sm:$0xff]   ;;  %v3993_v5 = vld [vmem:[#allocation10 + $0x40] ss:$8 sps:$4 sm:$0xff]   ;;  %v3998_v6 = vld [vmem:[#allocation10 + $0x34] ss:$8 sps:$4 sm:$0xff]  }
 0x48c   : > { %v2259_v17 = vrot.slane %v2251_v11, %v4678_v25  ;;  %v2266_v18 = vrot.slane %v2252_v12, %v4678_v25  ;;  %v2321_v19 = vcombine.low %v2243_v7, %v2250_v38  ;;  %v3545_v20 = vcombine.high %v2243_v7, %v2250_v38  ;;  %2897 = vmatprep.subr.bf16.mxu0 %v3989_v0  ;;  %v3996_v7 = vld [vmem:[#allocation10 + $0x30] ss:$8 sps:$4 sm:$0xff]   ;;  %v4001_v38 = vld [vmem:[#allocation10 + $0x24] ss:$8 sps:$4 sm:$0xff]   ;;  %v3999_v11 = vld [vmem:[#allocation10 + $0x20] ss:$8 sps:$4 sm:$0xff]  }
 0x48d   : > { %v2311_v21 = vcombine.low %v2294_v15, %v2302_v16  ;;  %v2310_v31 = vrot.slane %v2303_v28, %v4678_v25  ;;  %v4004_v12 = vld [vmem:[#allocation10 + $0x14] ss:$8 sps:$4 sm:$0xff]   ;;  %v4002_v13 = vld [vmem:[#allocation10 + $0x10] ss:$8 sps:$4 sm:$0xff]   ;;  %v4007_v14 = vld [vmem:[#allocation10 + $0x4] ss:$8 sps:$4 sm:$0xff]  }
 0x48e   : > { %v2328_v22 = vrot.slane %v2321_v19, %v4667_v8  ;;  %v2336_v23 = vrot.slane %v3545_v20, %v4667_v8  ;;  %v2337_v24 = vcombine.low %v2259_v17, %v2266_v18  ;;  %v3546_v26 = vcombine.high %v2259_v17, %v2266_v18  ;;  %v4005_v15 = vld [vmem:[#allocation10] ss:$8 sps:$4 sm:$0xff]   ;;  %v4010_v16 = vld [vmem:[#allocation10 + $0xf4] ss:$8 sps:$4 sm:$0xff]   ;;  %v4008_v17 = vld [vmem:[#allocation10 + $0xf0] ss:$8 sps:$4 sm:$0xff]  }
 0x48f   : > { %v2318_v43 = vrot.slane %v2311_v21, %v4678_v25  ;;  %2898 = vmatpush1.bf16.msra.mxu0 %v3987_v1 }
 0x490   : > { %v2344_v27 = vrot.slane %v2337_v24, %v4667_v8  ;;  %v2352_v40 = vrot.slane %v3546_v26, %v4667_v8  ;;  %v2353_v29 = vcombine.low %v2328_v22, %v2336_v23  ;;  %v2405_v8 = vld [vmem:[%s4948_s4] sm:$0x3]  ;;  %2899 = vmatprep.subr.bf16.mxu0 %v3992_v2 }
 0x491   : > { %v2320_v34 = vcombine.high %v2310_v31, %v2318_v43  ;;  %v2319_v36 = vcombine.low %v2310_v31, %v2318_v43  ;;  %v2410_v45 = vrot.slane %v2405_v8, %v4651_v41  ;;  %v2414_v10 = vrot.slane %v2405_v8, %v4654_v42  ;;  %v4013_v31 = vld [vmem:[#allocation10 + $0xe4] ss:$8 sps:$4 sm:$0xff]   ;;  %v4023_v8 = vld [vmem:[#allocation10 + $0xa0] ss:$8 sps:$4 sm:$0xff]  }
 0x492   : > { %v2361_v30 = vcombine.low %v2344_v27, %v2352_v40  ;;  %v2360_v32 = vrot.slane %v2353_v29, %v4678_v25 }
 0x493   : > { %2900 = vmatpush1.bf16.msra.mxu0 %v3990_v3 }
 0x494   : > { %v2368_v33 = vrot.slane %v2361_v30, %v4678_v25  ;;  %2901 = vmatprep.subr.bf16.mxu0 %v3995_v4  ;;  %v2624_v4 = vld [vmem:[%s4953_s9] sm:$0x3] }
 0x496   : > { %v2370_v35 = vcombine.high %v2360_v32, %v2368_v33  ;;  %v2369_v37 = vcombine.low %v2360_v32, %v2368_v33  ;;  %v4011_v32 = vld [vmem:[#allocation10 + $0xe0] ss:$8 sps:$4 sm:$0xff]   ;;  %v4016_v33 = vld [vmem:[#allocation10 + $0xd4] ss:$8 sps:$4 sm:$0xff]  }
 0x497   : > { %2902 = vmatpush1.bf16.msra.mxu0 %v3993_v5 }
 0x498   : > { %v2372_v39 = vpack.c.bf16 %v2370_v35, %v2320_v34  ;;  %v2371_v44 = vpack.c.bf16 %v2369_v37, %v2319_v36  ;;  %2903 = vmatprep.subr.bf16.mxu0 %v3998_v6  ;;  %v4014_v34 = vld [vmem:[#allocation10 + $0xd0] ss:$8 sps:$4 sm:$0xff]   ;;  %v4019_v35 = vld [vmem:[#allocation10 + $0xc4] ss:$8 sps:$4 sm:$0xff]   ;;  %v4017_v36 = vld [vmem:[#allocation10 + $0xc0] ss:$8 sps:$4 sm:$0xff]  }
 0x499   : > { %v4022_v37 = vld [vmem:[#allocation10 + $0xb4] ss:$8 sps:$4 sm:$0xff]   ;;  %v2625_v6 = vld [vmem:[%s4954_s10] sm:$0x3] }
 0x49a   : > { %2609 = vmatprep.mubr.bf16.mxu1 %v2372_v39  ;;  %v4020_v39 = vld [vmem:[#allocation10 + $0xb0] ss:$8 sps:$4 sm:$0xff]  }
 0x49b   : > { %2610 = vmatmul.mubr.bf16.vlgmr.msra.gmra.mxu1 %v2371_v44  ;;  %2904 = vmatpush1.bf16.msra.mxu0 %v3996_v7  ;;  %v4025_v44 = vld [vmem:[#allocation10 + $0xa4] ss:$8 sps:$4 sm:$0xff]  }
 0x49c   : > { %2905 = vmatprep.subr.bf16.mxu0 %v4001_v38  ;;  %v2663_v38 = vrot.slane %v2624_v4, %v4651_v41 }
 0x49f   : > { %2906 = vmatpush1.bf16.msra.mxu0 %v3999_v11  ;;  %v2667_v11 = vrot.slane %v2624_v4, %v4654_v42 }
 0x4a0   : > { %2907 = vmatprep.subr.bf16.mxu0 %v4004_v12 }
 0x4a3   : > { %2908 = vmatpush1.bf16.msra.mxu0 %v4002_v13 }
 0x4a4   : > { %2909 = vmatprep.subr.bf16.mxu0 %v4007_v14  ;;  %v2678_v14 = vrot.slane %v2625_v6, %v4651_v41 }
 0x4a7   : > { %2910 = vmatpush1.bf16.msra.mxu0 %v4005_v15  ;;  %v2682_v15 = vrot.slane %v2625_v6, %v4654_v42 }
 0x4a8   : > { %2911 = vmatprep.subr.bf16.mxu0 %v4010_v16 }
 0x4ab   : > { %2912 = vmatpush2.bf16.msra.mxu0 %v4008_v17 }
 0x4ac   : > { %2913 = vmatprep.subr.bf16.mxu0 %v4013_v31  ;;  %v4064_v31 = vld [vmem:[#allocation11 + $0xd4] ss:$8 sps:$4 sm:$0xff]  }
 0x4af   : > { %2914 = vmatpush2.bf16.msra.mxu0 %v4011_v32  ;;  %v4062_v32 = vld [vmem:[#allocation11 + $0xd0] ss:$8 sps:$4 sm:$0xff]  }
 0x4b0   : > { %2915 = vmatprep.subr.bf16.mxu0 %v4016_v33  ;;  %v4067_v33 = vld [vmem:[#allocation11 + $0xc4] ss:$8 sps:$4 sm:$0xff]  }
 0x4b3   : > { %2916 = vmatpush2.bf16.msra.mxu0 %v4014_v34  ;;  %v4065_v34 = vld [vmem:[#allocation11 + $0xc0] ss:$8 sps:$4 sm:$0xff]  }
 0x4b4   : > { %2917 = vmatprep.subr.bf16.mxu0 %v4019_v35  ;;  %v4070_v35 = vld [vmem:[#allocation11 + $0xb4] ss:$8 sps:$4 sm:$0xff]  }
 0x4b7   : > { %2918 = vmatpush2.bf16.msra.mxu0 %v4017_v36  ;;  %v4068_v36 = vld [vmem:[#allocation11 + $0xb0] ss:$8 sps:$4 sm:$0xff]  }
 0x4b8   : > { %2919 = vmatprep.subr.bf16.mxu0 %v4022_v37  ;;  %v4073_v37 = vld [vmem:[#allocation11 + $0xa4] ss:$8 sps:$4 sm:$0xff]  }
 0x4bb   : > { %2920 = vmatpush2.bf16.msra.mxu0 %v4020_v39  ;;  %v4071_v39 = vld [vmem:[#allocation11 + $0xa0] ss:$8 sps:$4 sm:$0xff]  }
 0x4bc   : > { %2921 = vmatprep.subr.bf16.mxu0 %v4025_v44  ;;  %v4076_v44 = vld [vmem:[#allocation11 + $0x94] ss:$8 sps:$4 sm:$0xff]  }
 0x4bf   : > { %2922 = vmatpush2.bf16.msra.mxu0 %v4023_v8  ;;  %v4074_v8 = vld [vmem:[#allocation11 + $0x90] ss:$8 sps:$4 sm:$0xff]  }
 0x55b   : > { %v2611_v25 = vpop.f32.mrf.mxu1 }
 0x55c   : > { %v2612_v46 = vadd.f32 %v2611_v25, %v2410_v45  ;;  %v4031_v25 = vld [vmem:[#allocation10 + $0x84] ss:$8 sps:$4 sm:$0xff]  }
 0x55d   : > { %v2613_v47 = vpop.f32.mrf.mxu1 }
 0x55e   : > { %v2614_v48 = vadd.f32 %v2613_v47, %v2414_v10  ;;  %v2620_v51 = vadd.f32 %v4112_v50, %v2612_v46  ;;  %v4029_v46 = vld [vmem:[#allocation10 + $0x80] ss:$8 sps:$4 sm:$0xff]   ;;  %v4032_v47 = vld [vmem:[#allocation11 + $0x70] ss:$8 sps:$4 sm:$0xff]  }
 0x55f   : > { %v2615_v49 = vpop.f32.mrf.mxu1  ;;  %v4035_v50 = vld [vmem:[#allocation11 + $0x60] ss:$8 sps:$4 sm:$0xff]  }
 0x560   : > { %v2621_v53 = vadd.f32 %v4113_v52, %v2614_v48  ;;  %v2616_v55 = vadd.f32 %v2615_v49, %v2410_v45  ;;  %v4028_v45 = vld [vmem:[#allocation10 + $0x94] ss:$8 sps:$4 sm:$0xff]   ;;  %v4037_v49 = vld [vmem:[#allocation11 + $0x64] ss:$8 sps:$4 sm:$0xff]   ;;  %v4038_v52 = vld [vmem:[#allocation11 + $0x50] ss:$8 sps:$4 sm:$0xff]  }
 0x561   : > { %v2617_v56 = vpop.f32.mrf.mxu1  ;;  %2923 = vmatprep.subr.bf16.mxu0 %v4028_v45  ;;  %v4034_v48 = vld [vmem:[#allocation11 + $0x74] ss:$8 sps:$4 sm:$0xff]   ;;  %v4077_v45 = vld [vmem:[#allocation11 + $0x80] ss:$8 sps:$4 sm:$0xff]  }
 0x562   : > { %v2618_v57 = vadd.f32 %v2617_v56, %v2414_v10  ;;  %v2626_v9 = vadd.f32 %v2621_v53, %v2620_v51  ;;  %v2622_v59 = vadd.f32 %v4114_v58, %v2616_v55  ;;  %v4026_v10 = vld [vmem:[#allocation10 + $0x90] ss:$8 sps:$4 sm:$0xff]   ;;  %3164 = vmatprep.subr.bf16.mxu1 %v4034_v48  ;;  %v4041_v55 = vld [vmem:[#allocation11 + $0x40] ss:$8 sps:$4 sm:$0xff]   ;;  %v4046_v56 = vld [vmem:[#allocation11 + $0x34] ss:$8 sps:$4 sm:$0xff]  }
 0x563   : > { %2924 = vmatpush2.bf16.msra.mxu0 %v4026_v10  ;;  %3165 = vmatpush1.bf16.msra.mxu1 %v4032_v47  ;;  %v4047_v58 = vld [vmem:[#allocation11 + $0x20] ss:$8 sps:$4 sm:$0xff]   ;;  %v4079_v10 = vld [vmem:[#allocation11 + $0x84] ss:$8 sps:$4 sm:$0xff]  }
 0x564   : > { %v2623_v60 = vadd.f32 %v4115_v54, %v2618_v57  ;;  %2627 = vadd.xlane.f32.xlu0 %v2626_v9  ;;  %2925 = vmatprep.subr.bf16.mxu0 %v4031_v25  ;;  %v4044_v57 = vld [vmem:[#allocation11 + $0x30] ss:$8 sps:$4 sm:$0xff]   ;;  %v4049_v9 = vld [vmem:[#allocation11 + $0x24] ss:$8 sps:$4 sm:$0xff]  }
 0x565   : > { %3166 = vmatprep.subr.bf16.mxu1 %v4037_v49  ;;  %v4050_v54 = vld [vmem:[#allocation11 + $0x10] ss:$8 sps:$4 sm:$0xff]  }
 0x566   : > { %v2629_v61 = vadd.f32 %v2623_v60, %v2622_v59  ;;  %v2723_v25 = vld [vmem:[%s4950_s6] sm:$0x3] }
 0x567   : > { %2926 = vmatpush2.bf16.msra.mxu0 %v4029_v46  ;;  %3167 = vmatpush1.bf16.msra.mxu1 %v4035_v50  ;;  %v2728_v46 = vrot.slane %v2723_v25, %v4651_v41  ;;  %v2732_v47 = vrot.slane %v2723_v25, %v4654_v42 }
 0x568   : > { %2630 = vadd.xlane.f32.xlu1 %v2629_v61  ;;  %v4053_v61 = vld [vmem:[#allocation11] ss:$8 sps:$4 sm:$0xff]  }
 0x5ed   : > { %v2628_v18 = vpop.xlane.xlu0 %2627 }
 0x5ee   : > { %v2633_v19 = vmul.f32 0.00390625, %v2628_v18 }
 0x5f0   : > { %v4827_v20 = vsub.f32 %v2620_v51, %v2633_v19  ;;  %v4829_v21 = vsub.f32 %v2621_v53, %v2633_v19  ;;  %v4040_v51 = vld [vmem:[#allocation11 + $0x54] ss:$8 sps:$4 sm:$0xff]   ;;  %v4043_v53 = vld [vmem:[#allocation11 + $0x44] ss:$8 sps:$4 sm:$0xff]  }
 0x5f1   : > { %v2631_v22 = vpop.xlane.xlu1 %2630  ;;  %3168 = vmatprep.subr.bf16.mxu1 %v4040_v51 }
 0x5f2   : > { %v2634_v23 = vmul.f32 0.00390625, %v2631_v22  ;;  %v2639_v24 = vmul.f32 %v4827_v20, %v4827_v20  ;;  %v2640_v26 = vmul.f32 %v4829_v21, %v4829_v21  ;;  %3169 = vmatpush1.bf16.msra.mxu1 %v4038_v52 }
 0x5f3   : > { %3170 = vmatprep.subr.bf16.mxu1 %v4043_v53 }
 0x5f4   : > { %v4835_v27 = vsub.f32 %v2622_v59, %v2634_v23  ;;  %v4837_v40 = vsub.f32 %v2623_v60, %v2634_v23  ;;  %v2643_v28 = vadd.f32 %v2640_v26, %v2639_v24  ;;  %v4052_v59 = vld [vmem:[#allocation11 + $0x14] ss:$8 sps:$4 sm:$0xff]   ;;  %v4055_v60 = vld [vmem:[#allocation11 + $0x4] ss:$8 sps:$4 sm:$0xff]  }
 0x5f6   : > { %2644 = vadd.xlane.f32.xlu0 %v2643_v28  ;;  %v2641_v29 = vmul.f32 %v4835_v27, %v4835_v27  ;;  %v2642_v43 = vmul.f32 %v4837_v40, %v4837_v40  ;;  %3171 = vmatpush1.bf16.msra.mxu1 %v4041_v55 }
 0x5f7   : > { %3172 = vmatprep.subr.bf16.mxu1 %v4046_v56 }
 0x5f8   : > { %v2646_v30 = vadd.f32 %v2642_v43, %v2641_v29  ;;  %v4056_v29 = vld [vmem:[#allocation11 + $0xf0] ss:$8 sps:$4 sm:$0xff]   ;;  %v4061_v43 = vld [vmem:[#allocation11 + $0xe4] ss:$8 sps:$4 sm:$0xff]  }
 0x5fa   : > { %2647 = vadd.xlane.f32.xlu1 %v2646_v30  ;;  %3173 = vmatpush1.bf16.msra.mxu1 %v4044_v57  ;;  %v4059_v30 = vld [vmem:[#allocation11 + $0xe0] ss:$8 sps:$4 sm:$0xff]  }
 0x5fb   : > { %3174 = vmatprep.subr.bf16.mxu1 %v4049_v9 }
 0x5fe   : > { %3175 = vmatpush1.bf16.msra.mxu1 %v4047_v58 }
 0x5ff   : > { %3176 = vmatprep.subr.bf16.mxu1 %v4052_v59 }
 0x602   : > { %3177 = vmatpush1.bf16.msra.mxu1 %v4050_v54 }
 0x603   : > { %3178 = vmatprep.subr.bf16.mxu1 %v4055_v60 }
 0x606   : > { %3179 = vmatpush1.bf16.msra.mxu1 %v4053_v61 }
 0x67f   : > { %v2645_v62 = vpop.xlane.xlu0 %2644 }
 0x680   : > { %v2649_v63 = vmul.f32 0.00390625, %v2645_v62 }
 0x682   : > { %v2651_v0 = vadd.f32 1e-05, %v2649_v63 }
 0x683   : > { %v2648_v1 = vpop.xlane.xlu1 %2647 }
 0x684   : > { %4096 = vrsqrt.f32 %v2651_v0  ;;  %v2650_v2 = vmul.f32 0.00390625, %v2648_v1 }
 0x686   : > { %v2652_v3 = vadd.f32 1e-05, %v2650_v2 }
 0x688   : > { %4098 = vrsqrt.f32 %v2652_v3 }
 0x691   : > { %v4097_v5 = vpop.eup %4096 }
 0x692   : > { %v2656_v7 = vmul.f32 %v4097_v5, %v4829_v21  ;;  %v2655_v12 = vmul.f32 %v4097_v5, %v4827_v20 }
 0x694   : > { %v2671_v17 = vmul.f32 %v2667_v11, %v2656_v7  ;;  %v2670_v19 = vmul.f32 %v2663_v38, %v2655_v12 }
 0x695   : > { %v4099_v13 = vpop.eup %4098 }
 0x696   : > { %v2658_v16 = vmul.f32 %v4099_v13, %v4837_v40  ;;  %v2657_v18 = vmul.f32 %v4099_v13, %v4835_v27  ;;  %v4857_v21 = vadd.f32 %v2682_v15, %v2671_v17  ;;  %v4861_v26 = vadd.f32 %v2678_v14, %v2670_v19  ;;  %v4058_v27 = vld [vmem:[#allocation11 + $0xf4] ss:$8 sps:$4 sm:$0xff]  }
 0x697   : > { %3180 = vmatprep.subr.bf16.mxu1 %v4058_v27 }
 0x698   : > { %v2673_v22 = vmul.f32 %v2667_v11, %v2658_v16  ;;  %v2672_v23 = vmul.f32 %v2663_v38, %v2657_v18  ;;  %3181 = vmatpush2.bf16.msra.mxu1 %v4056_v29 }
 0x699   : > { %3182 = vmatprep.subr.bf16.mxu1 %v4061_v43 }
 0x69a   : > { %v4859_v24 = vadd.f32 %v2682_v15, %v2673_v22  ;;  %v4863_v20 = vadd.f32 %v2678_v14, %v2672_v23  ;;  %v2992_v15 = vld [vmem:[%s4952_s8] sm:$0x3] }
 0x69b   : > { %v2997_v16 = vrot.slane %v2992_v15, %v4651_v41  ;;  %v3001_v17 = vrot.slane %v2992_v15, %v4654_v42 }
 0x69c   : > { %v2690_v28 = vpack.c.bf16 %v4859_v24, %v4857_v21  ;;  %v2689_v40 = vpack.c.bf16 %v4863_v20, %v4861_v26  ;;  %3183 = vmatpush2.bf16.msra.mxu1 %v4059_v30 }
 0x69d   : > { %3184 = vmatprep.subr.bf16.mxu1 %v4064_v31 }
 0x69e   : > { %2927 = vmatprep.mubr.bf16.mxu0 %v2690_v28 }
 0x69f   : > { %2928 = vmatmul.mubr.bf16.vlgmr.msra.gmra.mxu0 %v2689_v40 }
 0x6a0   : > { %3185 = vmatpush2.bf16.msra.mxu1 %v4062_v32 }
 0x6a1   : > { %3186 = vmatprep.subr.bf16.mxu1 %v4067_v33 }
 0x6a4   : > { %3187 = vmatpush2.bf16.msra.mxu1 %v4065_v34 }
 0x6a5   : > { %3188 = vmatprep.subr.bf16.mxu1 %v4070_v35 }
 0x6a8   : > { %3189 = vmatpush2.bf16.msra.mxu1 %v4068_v36 }
 0x6a9   : > { %3190 = vmatprep.subr.bf16.mxu1 %v4073_v37 }
 0x6ac   : > { %3191 = vmatpush2.bf16.msra.mxu1 %v4071_v39 }
 0x6ad   : > { %3192 = vmatprep.subr.bf16.mxu1 %v4076_v44 }
 0x6b0   : > { %3193 = vmatpush2.bf16.msra.mxu1 %v4074_v8 }
 0x6b1   : > { %3194 = vmatprep.subr.bf16.mxu1 %v4079_v10 }
 0x6b4   : > { %3195 = vmatpush2.bf16.msra.mxu1 %v4077_v45 }
 0x75f   : > { %v2929_v48 = vpop.f32.mrf.mxu0 }
 0x760   : > { %v2930_v49 = vadd.f32 %v2929_v48, %v2728_v46 }
 0x761   : > { %v2931_v50 = vpop.f32.mrf.mxu0 }
 0x762   : > { %v2932_v51 = vadd.f32 %v2931_v50, %v2732_v47  ;;  %v2942_v52 = vmul.f32 0.70710677, %v2930_v49  ;;  %v2938_v6 = vmul.f32 0.5, %v2930_v49 }
 0x763   : > { %v2933_v53 = vpop.f32.mrf.mxu0 }
 0x764   : > { %v2943_v55 = vmul.f32 0.70710677, %v2932_v51  ;;  %v2934_v56 = vadd.f32 %v2933_v53, %v2728_v46  ;;  %v2939_v3 = vmul.f32 0.5, %v2932_v51  ;;  %v3211_v53 = vld [vmem:[%s4955_s11] sm:$0x3] }
 0x765   : > { %v2935_v57 = vpop.f32.mrf.mxu0 }
 0x766   : > { %4100 = verf.f32 %v2943_v55  ;;  %v2944_v9 = vmul.f32 0.70710677, %v2934_v56  ;;  %v2936_v58 = vadd.f32 %v2935_v57, %v2732_v47  ;;  %v2940_v2 = vmul.f32 0.5, %v2934_v56  ;;  %v3212_v55 = vld [vmem:[%s4956_s12] sm:$0x3] }
 0x767   : > { %4102 = verf.f32 %v2942_v52  ;;  %v3249_v56 = vrot.slane %v3211_v53, %v4651_v41  ;;  %v3253_v57 = vrot.slane %v3211_v53, %v4654_v42 }
 0x768   : > { %4104 = verf.f32 %v2944_v9  ;;  %v2945_v59 = vmul.f32 0.70710677, %v2936_v58  ;;  %v2941_v4 = vmul.f32 0.5, %v2936_v58  ;;  %v3264_v58 = vrot.slane %v3212_v55, %v4651_v41 }
 0x76a   : > { %4106 = verf.f32 %v2945_v59  ;;  %v3268_v59 = vrot.slane %v3212_v55, %v4654_v42 }
 0x773   : > { %v4101_v54 = vpop.eup %4100 }
 0x774   : > { %v4103_v60 = vpop.eup %4102  ;;  %v2951_v62 = vadd.f32 1.0, %v4101_v54 }
 0x775   : > { %v4105_v61 = vpop.eup %4104  ;;  %v2950_v1 = vadd.f32 1.0, %v4103_v60 }
 0x776   : > { %v2952_v63 = vadd.f32 1.0, %v4105_v61  ;;  %v2955_v38 = vmul.f32 %v2951_v62, %v2939_v3 }
 0x777   : > { %v4107_v0 = vpop.eup %4106  ;;  %v2954_v12 = vmul.f32 %v2950_v1, %v2938_v6 }
 0x778   : > { %v2953_v5 = vadd.f32 1.0, %v4107_v0  ;;  %v2956_v7 = vmul.f32 %v2952_v63, %v2940_v2 }
 0x77a   : > { %v2957_v11 = vmul.f32 %v2953_v5, %v2941_v4  ;;  %v2958_v14 = vpack.c.bf16 %v2956_v7, %v2954_v12 }
 0x77c   : > { %v2959_v13 = vpack.c.bf16 %v2957_v11, %v2955_v38 }
 0x77e   : > { %3196 = vmatprep.mubr.bf16.mxu1 %v2959_v13 }
 0x77f   : > { %3197 = vmatmul.mubr.bf16.vlgmr.msra.gmra.mxu1 %v2958_v14 }
 0x83f   : > { %v3198_v18 = vpop.f32.mrf.mxu1 }
 0x840   : > { %v3199_v19 = vadd.f32 %v3198_v18, %v2997_v16 }
 0x841   : > { %v3200_v22 = vpop.f32.mrf.mxu1 }
 0x842   : > { %v3201_v23 = vadd.f32 %v3200_v22, %v3001_v17  ;;  %v3207_v40 = vadd.f32 %v3199_v19, %v4861_v26 }
 0x843   : > { %v3202_v28 = vpop.f32.mrf.mxu1 }
 0x844   : > { %v3208_v27 = vadd.f32 %v3201_v23, %v4857_v21  ;;  %v3203_v29 = vadd.f32 %v3202_v28, %v2997_v16 }
 0x845   : > { %v3204_v43 = vpop.f32.mrf.mxu1 }
 0x846   : > { %v3205_v30 = vadd.f32 %v3204_v43, %v3001_v17  ;;  %v3213_v31 = vadd.f32 %v3208_v27, %v3207_v40  ;;  %v3209_v32 = vadd.f32 %v3203_v29, %v4863_v20 }
 0x848   : > { %v3210_v33 = vadd.f32 %v3205_v30, %v4859_v24  ;;  %3214 = vadd.xlane.f32.xlu0 %v3213_v31 }
 0x84a   : > { %v3216_v34 = vadd.f32 %v3210_v33, %v3209_v32 }
 0x84c   : > { %3217 = vadd.xlane.f32.xlu1 %v3216_v34 }
 0x8d1   : > { %v3215_v35 = vpop.xlane.xlu0 %3214 }
 0x8d2   : > { %v3219_v36 = vmul.f32 0.00390625, %v3215_v35 }
 0x8d4   : > { %v3221_v37 = vsub.f32 %v3207_v40, %v3219_v36  ;;  %v3222_v39 = vsub.f32 %v3208_v27, %v3219_v36 }
 0x8d5   : > { %v3218_v44 = vpop.xlane.xlu1 %3217 }
 0x8d6   : > { %v3220_v8 = vmul.f32 0.00390625, %v3218_v44  ;;  %v3225_v26 = vmul.f32 %v3221_v37, %v3221_v37  ;;  %v3226_v45 = vmul.f32 %v3222_v39, %v3222_v39 }
 0x8d8   : > { %v3223_v21 = vsub.f32 %v3209_v32, %v3220_v8  ;;  %v3224_v10 = vsub.f32 %v3210_v33, %v3220_v8  ;;  %v3229_v25 = vadd.f32 %v3226_v45, %v3225_v26 }
 0x8da   : > { %3230 = vadd.xlane.f32.xlu0 %v3229_v25  ;;  %v3227_v46 = vmul.f32 %v3223_v21, %v3223_v21  ;;  %v3228_v47 = vmul.f32 %v3224_v10, %v3224_v10 }
 0x8dc   : > { %v3232_v20 = vadd.f32 %v3228_v47, %v3227_v46 }
 0x8de   : > { %3233 = vadd.xlane.f32.xlu1 %v3232_v20 }
 0x963   : > { %v3231_v24 = vpop.xlane.xlu0 %3230 }
 0x964   : > { %v3235_v48 = vmul.f32 0.00390625, %v3231_v24 }
 0x966   : > { %v3237_v49 = vadd.f32 1e-05, %v3235_v48 }
 0x967   : > { %v3234_v50 = vpop.xlane.xlu1 %3233 }
 0x968   : > { %4108 = vrsqrt.f32 %v3237_v49  ;;  %v3236_v51 = vmul.f32 0.00390625, %v3234_v50 }
 0x96a   : > { %v3238_v52 = vadd.f32 1e-05, %v3236_v51 }
 0x96c   : > { %4110 = vrsqrt.f32 %v3238_v52 }
 0x975   : > { %v4109_v9 = vpop.eup %4108 }
 0x976   : > { %v3241_v54 = vmul.f32 %v4109_v9, %v3221_v37  ;;  %v3242_v60 = vmul.f32 %v4109_v9, %v3222_v39 }
 0x978   : > { %v3256_v61 = vmul.f32 %v3249_v56, %v3241_v54  ;;  %v3257_v62 = vmul.f32 %v3253_v57, %v3242_v60 }
 0x979   : > { %v4111_v63 = vpop.eup %4110 }
 0x97a   : > { %v3271_v0 = vadd.f32 %v3264_v58, %v3256_v61  ;;  %v3272_v1 = vadd.f32 %v3268_v59, %v3257_v62  ;;  %v3243_v2 = vmul.f32 %v4111_v63, %v3223_v21  ;;  %v3244_v3 = vmul.f32 %v4111_v63, %v3224_v10 }
 0x97c   : > { %3275 = vst [vmem:[%s529_s15] sm:$0xff] %v3271_v0  ;;  %3276 = vst [vmem:[%s529_s15 + $0x8] sm:$0xff] %v3272_v1  ;;  %v3258_v41 = vmul.f32 %v3249_v56, %v3243_v2  ;;  %v3259_v4 = vmul.f32 %v3253_v57, %v3244_v3 }
 0x97e   : > { %v3273_v42 = vadd.f32 %v3264_v58, %v3258_v41  ;;  %v3274_v5 = vadd.f32 %v3268_v59, %v3259_v4 }
 0x980   : > { %3277 = vst [vmem:[%s529_s15 + $0x10] sm:$0xff] %v3273_v42  ;;  %3278 = vst [vmem:[%s529_s15 + $0x18] sm:$0xff] %v3274_v5 }
 0x981   : > { %4287 = shalt.err (!%p4284_p3)
}
 0x982   : > { %s4288_s16 = scalar_lea.hbm %s4899_s23, 512  ;;  %s4292_s3 = scalar_lea.hbm %s4993_s17, 1024 }
 0x983   : > { %p4289_p4 = scmp.ne.s32.totalorder %s4899_s23, %s4288_s16  ;;  %p4293_p2 = scmp.lt.s32.totalorder %s4899_s23, %s4993_s17 }
 0x984   : > { %p4294_p7 = scmp.lt.s32.totalorder %s4292_s3, %s4288_s16 }
 0x985   : > { %p4290_p12 = pnand %p4289_p4, %p4994_p11 }
 0x986   : > { %p4295_p8 = por %p4294_p7, %p4293_p2 }
 0x987   : > { %p4291_p6 = pneg %p4290_p12 }
 0x989   : > { %p4296_p10 = pnand %p4295_p8, %p4291_p6 }
 0x98b   : > { %4299 = shalt.err (!%p4296_p10)
}
 0x98c   : > { %s4370_s18 = smov 256   ;;  %s4371_s20 = smov 16  }
 0x98d   : > { %3704 = dma.vmem_to_hbm [thread:$0]  (%p4994_p11), %s4901_s29, 512, %s4899_s23, %s3280_s14, %s4370_s18, %s4370_s18, %s4371_s20  }
 0x98e PF: > { %s3308_s22 = sand.u32 1, %s4338_s25   ;;  %p4995_p0 = scmp.ne.s32.totalorder %s4983_s24, 0 }
 0x98f   : > { %p4996_p13 = scmp.ge.s32.totalorder %s4350_s28, 2  ;;  %s3309_s5 = scalar_lea.sflag [#allocation4], %s3308_s22 }
 0x991   : > { %p3727_p5 = pnand %p4996_p13, %p4995_p0 }
 0x993   : > { %p3728_p9 = pneg %p3727_p5 }
 0x995   : > { %4333 = dma.done.wait (%p3728_p9), %s3309_s5, 512  }
 0x996   : > { %4335 = vsyncadd (%p3728_p9), %s3309_s5, 4294966784  ;;  %s4997_s19 = sld [smem:[#allocation19_spill]]  ;;  %p29_p1 = scmp.ge.s32.totalorder %s4543_s21, 4  }
 0x997   : > { %s4998_s25 = smov %s4342_s26  ;;  %s4999_s26 = smov %s4346_s27 }
 0x998   : > { %s5001_s28 = smov %s4543_s21  ;;  %31 = sbr.rel (!%p29_p1) target bundleno = 15 (0xf), region = 137 }
 0x99c   : > { %s5000_s27 = smov %s4997_s19 }
 0x99d   :  { %3314 = vsyncpa [#allocation3], 1 }
 0x99e   :  { %3316 = vsyncpa [#allocation3 + $0x1], 1 }
 0x99f   :  { %3317 = vsyncpa [#allocation6], 1 }
 0x9a0   :  { %3318 = vsyncpa [#allocation9], 1 }
 0x9a1   :  { %3319 = vsyncpa [#allocation12], 1 }
 0x9a2   :  { %3320 = vsyncpa [#allocation4], 1 }
 0x9a3   :  { %3322 = vsyncpa [#allocation4 + $0x1], 1 }

</bundles_post_ra>
